<compile_context>
chip_gen: v5e
topology: v5e:2x2
jax: 0.10.0
libtpu: 0.0.40
codegen_flags: <defaults>
</compile_context>

<pallas_src>
import jax
import jax.numpy as jnp
from jax import lax
from jax.experimental import pallas as pl
from jax.experimental.pallas import tpu as pltpu


def gru_ar_kernel(ids_ref, h0_ref, emb_wih_ref, whh_ref, bihc_ref, bhn_ref,
                  wout_ref, bout_ref, out_ref, h_scr, gi_scr, hseq_scr):
    """One time-chunk of the GRU recurrence + output head (all in VMEM).

    ids_ref     : (rows, 1)        int32  token ids, time-major (row = t*bsp + b)
    h0_ref      : (bsp, H)         f32    initial hidden state (batch padded)
    emb_wih_ref : (classes, 3H)    bf16   emb @ Wih (embedding folded into input gates)
    whh_ref     : (H, 3H)          bf16   fused (r|z|n) hidden weights (transposed)
    bihc_ref    : (1, 3H)          f32    bih + (bhh_r | bhh_z | 0) pre-folded
    bhn_ref     : (1, H)           f32    bhh_n (must stay inside r*(gh_n + b_hn))
    wout_ref    : (H, C)           bf16
    bout_ref    : (1, C)           f32
    out_ref     : (rows, C)        f32    log-probabilities for this chunk
    h_scr       : (bsp, H)         f32    hidden-state carry (persists across chunks)
    gi_scr      : (rows, 3H)       f32    input-side gate pre-activations
    hseq_scr    : (rows, H)        bf16   per-step hidden states (matmul operand)
    """
    bsp, H = h_scr.shape
    rows = gi_scr.shape[0]
    tn = rows // bsp
    classes = emb_wih_ref.shape[0]

    # Hidden-state carry initialized only on the first time chunk.
    @pl.when(pl.program_id(0) == 0)
    def _():
        h_scr[...] = h0_ref[...]

    # Fused embedding lookup + input-side gate matmul for the whole chunk
    # (one off-chain MXU matmul; r/z hidden biases are already folded into bihc).
    ids = ids_ref[...]                                               # (rows, 1) int32
    iota = lax.broadcasted_iota(jnp.int32, (rows, classes), 1)
    onehot = jnp.where(ids == iota, 1.0, 0.0).astype(emb_wih_ref.dtype)
    gi_scr[...] = (
        jnp.dot(onehot, emb_wih_ref[...], preferred_element_type=jnp.float32)
        + bihc_ref[...]
    )

    whh = whh_ref[...]                                               # (H, 3H) bf16
    bhn = bhn_ref[...]                                               # (1, H)  f32

    def step(i, h):
        # h stays register-resident across the whole chunk (no VMEM round-trip).
        off = pl.multiple_of(i * bsp, bsp)                           # sublane-aligned
        gh = jnp.dot(h.astype(whh.dtype), whh,
                     preferred_element_type=jnp.float32)             # (bsp, 3H)
        gi = gi_scr[pl.ds(off, bsp), :]                              # aligned load
        r = jax.nn.sigmoid(gi[:, :H] + gh[:, :H])
        z = jax.nn.sigmoid(gi[:, H:2 * H] + gh[:, H:2 * H])
        n = jnp.tanh(gi[:, 2 * H:] + r * (gh[:, 2 * H:] + bhn))
        h_new = (1.0 - z) * n + z * h
        hseq_scr[pl.ds(off, bsp), :] = h_new.astype(hseq_scr.dtype)  # aligned bf16 store
        return h_new

    # TODO(synk): keep Whh resident in the MXU across the chunk via
    # pltpu.matmul_push_rhs / matmul_acc_lhs / matmul_pop instead of re-pushing the
    # RHS with jnp.dot every step (valid while H <= MXU tile).
    h_final = lax.fori_loop(0, tn, step, h_scr[...], unroll=min(8, tn))
    h_scr[...] = h_final                                             # persist for next chunk

    # Output projection + log_softmax for the whole chunk (off the serial chain).
    logits = (
        jnp.dot(hseq_scr[...], wout_ref[...], preferred_element_type=jnp.float32)
        + bout_ref[...]
    )                                                                # (rows, C)
    m = jnp.max(logits, axis=-1, keepdims=True)
    lse = jnp.log(jnp.sum(jnp.exp(logits - m), axis=-1, keepdims=True)) + m
    # TODO(synk): C < 128 lanes -> masked vst; packing 8 rows into one 128-lane row
    # needs a sublane->lane relayout that Mosaic may not lower; left unpacked.
    out_ref[...] = (logits - lse).astype(out_ref.dtype)


def _vmem_estimate(rows, bsp, H, C, classes):
    """Rough VMEM footprint (double-buffered blocks + scratch), with tile padding."""
    pad_l = lambda n: ((n + 127) // 128) * 128
    pad_s = lambda n: ((n + 7) // 8) * 8
    b = 0
    b += 2 * pad_s(rows) * pad_l(1) * 4            # ids blocks
    b += 2 * pad_s(bsp) * pad_l(H) * 4             # h0
    b += 2 * pad_s(classes) * pad_l(3 * H) * 2     # emb @ Wih
    b += 2 * pad_s(H) * pad_l(3 * H) * 2           # Whh
    b += 2 * pad_s(1) * pad_l(3 * H) * 4           # fused input bias
    b += 2 * pad_s(1) * pad_l(H) * 4               # bhh_n
    b += 2 * pad_s(H) * pad_l(C) * 2               # Wout
    b += 2 * pad_s(1) * pad_l(C) * 4               # bout
    b += 2 * pad_s(rows) * pad_l(C) * 4            # out blocks
    b += pad_s(bsp) * pad_l(H) * 4                 # h carry scratch
    b += pad_s(rows) * pad_l(3 * H) * 4            # gi scratch
    b += pad_s(rows) * pad_l(H) * 2                # hseq scratch (bf16)
    return b


def gru_autoregressor_forward(X, h0, params, *, time_tile=128):
    """[X (bs, N) int32], [h0 (bs, H)] -> [X_logp (bs, N, classes)]"""
    emb = params["in_embedding"]                  # (classes, H)
    wih, whh = params["wih"], params["whh"]       # (3, H, H), gate order r,z,n (transposed)
    bih, bhh = params["bih"], params["bhh"]       # (3, 1, H)
    wout, bout = params["wout"], params["bout"]   # (H, C), (1, C)

    bs, N = X.shape
    H = h0.shape[1]
    C = wout.shape[1]
    classes = emb.shape[0]

    bsp = ((bs + 7) // 8) * 8                     # batch padded to a sublane multiple

    # Time tile: multiple of 8 timesteps, shrunk if the VMEM budget would be exceeded.
    tn = max(8, min(int(time_tile), ((N + 7) // 8) * 8))
    tn = ((tn + 7) // 8) * 8
    while tn > 8 and _vmem_estimate(tn * bsp, bsp, H, C, classes) > (32 << 20):
        tn = max(8, ((tn // 2) + 7) // 8 * 8)
    n_pad = ((N + tn - 1) // tn) * tn
    rows = tn * bsp
    vmem_limit = int(min(max(2 * _vmem_estimate(rows, bsp, H, C, classes), 16 << 20),
                         64 << 20))

    # --- parameter folding (once, in the wrapper, off the serial chain) ---
    wih_cat = jnp.concatenate([wih[0], wih[1], wih[2]], axis=1)           # (H, 3H) f32
    whh_cat = jnp.concatenate([whh[0], whh[1], whh[2]], axis=1).astype(jnp.bfloat16)
    # embedding folded into the input-gate weights: gi = onehot(ids) @ (emb @ Wih)
    emb_wih = jnp.dot(emb, wih_cat).astype(jnp.bfloat16)                  # (classes, 3H)
    # r/z hidden biases folded into the input bias; only b_hn stays inside the step
    bihc = jnp.concatenate([bih[0] + bhh[0], bih[1] + bhh[1], bih[2]],
                           axis=1).astype(jnp.float32)                    # (1, 3H)
    bhn = bhh[2].astype(jnp.float32)                                      # (1, H)
    wout_b = wout.astype(jnp.bfloat16)
    bout_f = bout.astype(jnp.float32)

    # Token ids, time-major, padded (batch -> bsp, time -> n_pad); pad id 0 is harmless
    # because padded rows/steps are sliced away and h_final is never returned.
    ids_tm = jnp.pad(X.T, ((0, n_pad - N), (0, bsp - bs)))                # (n_pad, bsp)
    ids_flat = ids_tm.reshape(n_pad * bsp, 1)

    h0_pad = jnp.pad(h0.astype(jnp.float32), ((0, bsp - bs), (0, 0)))     # (bsp, H)

    out_flat = pl.pallas_call(
        gru_ar_kernel,
        out_shape=jax.ShapeDtypeStruct((n_pad * bsp, C), jnp.float32),
        grid_spec=pltpu.PrefetchScalarGridSpec(
            num_scalar_prefetch=0,
            grid=(n_pad // tn,),
            in_specs=[
                pl.BlockSpec((rows, 1), lambda t: (t, 0)),            # token ids
                pl.BlockSpec((bsp, H), lambda t: (0, 0)),             # h0 (padded)
                pl.BlockSpec((classes, 3 * H), lambda t: (0, 0)),     # emb @ Wih (fused)
                pl.BlockSpec((H, 3 * H), lambda t: (0, 0)),           # Whh (fused r|z|n)
                pl.BlockSpec((1, 3 * H), lambda t: (0, 0)),           # bih + bhh_{r,z}
                pl.BlockSpec((1, H), lambda t: (0, 0)),               # bhh_n
                pl.BlockSpec((H, C), lambda t: (0, 0)),               # Wout
                pl.BlockSpec((1, C), lambda t: (0, 0)),               # bout
            ],
            # TODO(synk): single-buffer the revisited constant weight blocks
            # (pipeline_mode=pl.Buffered(1)) to halve their VMEM footprint.
            out_specs=pl.BlockSpec((rows, C), lambda t: (t, 0)),
            scratch_shapes=[
                pltpu.VMEM((bsp, H), jnp.float32),        # hidden-state carry
                pltpu.VMEM((rows, 3 * H), jnp.float32),   # chunk gi pre-activations
                pltpu.VMEM((rows, H), jnp.bfloat16),      # chunk hidden states
            ],
        ),
        # Sequential recurrence over time chunks.
        # TODO(synk): on v7x, add a leading "parallel" batch-shard grid axis (each shard
        # carrying its own h_scr) to use the second TensorCore once bs is large enough.
        compiler_params=pltpu.CompilerParams(
            dimension_semantics=("arbitrary",),
            vmem_limit_bytes=vmem_limit,
        ),
    )(ids_flat, h0_pad, emb_wih, whh_cat, bihc, bhn, wout_b, bout_f)

    out = out_flat.reshape(n_pad, bsp, C)[:N, :bs]        # (N, bs, C)
    # TODO(synk): emit a batch-major / lane-dense layout from the kernel to drop this
    # final transpose (one extra HBM pass over the output).
    return jnp.transpose(out, (1, 0, 2))                  # (bs, N, C)


def gru_autoregressor_reference(X, h0, params):
    """Pure-JAX reference in the standard (non-folded) GRU form, bf16 matmul operands."""
    emb = params["in_embedding"]
    wih, whh = params["wih"], params["whh"]
    bih, bhh = params["bih"], params["bhh"]
    wout, bout = params["wout"], params["bout"]
    H = h0.shape[1]

    wih_b = jnp.concatenate([wih[0], wih[1], wih[2]], axis=1).astype(jnp.bfloat16)
    whh_b = jnp.concatenate([whh[0], whh[1], whh[2]], axis=1).astype(jnp.bfloat16)
    bih_c = jnp.concatenate([bih[0], bih[1], bih[2]], axis=1).astype(jnp.float32)
    bhh_c = jnp.concatenate([bhh[0], bhh[1], bhh[2]], axis=1).astype(jnp.float32)

    x = jnp.take(emb, X, axis=0).astype(jnp.bfloat16)                  # (bs, N, H)

    def step(h, x_t):
        gi = jnp.dot(x_t, wih_b, preferred_element_type=jnp.float32) + bih_c
        gh = jnp.dot(h.astype(jnp.bfloat16), whh_b,
                     preferred_element_type=jnp.float32) + bhh_c
        r = jax.nn.sigmoid(gi[:, :H] + gh[:, :H])
        z = jax.nn.sigmoid(gi[:, H:2 * H] + gh[:, H:2 * H])
        n = jnp.tanh(gi[:, 2 * H:] + r * gh[:, 2 * H:])
        h_new = (1.0 - z) * n + z * h
        return h_new, h_new

    _, hs = lax.scan(step, h0.astype(jnp.float32), jnp.swapaxes(x, 0, 1))  # (N, bs, H)
    logits = jnp.dot(hs.astype(jnp.bfloat16), wout.astype(jnp.bfloat16),
                     preferred_element_type=jnp.float32) + bout
    logp = jax.nn.log_softmax(logits, axis=-1)                         # (N, bs, C)
    return jnp.swapaxes(logp, 0, 1)                                    # (bs, N, C)


def init_params(key, classes, hidden_units):
    """Deterministic synthetic parameters matching nn.Embedding / nn.GRU / nn.Linear shapes."""
    ks = jax.random.split(key, 7)
    scale = 1.0 / jnp.sqrt(jnp.float32(hidden_units))
    params = {
        # nn.Embedding(classes, H): weight (classes, H), N(0, 1) default init
        "in_embedding": jax.random.normal(ks[0], (classes, hidden_units), jnp.float32),
        # nn.GRU weight_ih_l0 (3H, H) / weight_hh_l0 (3H, H); stored transposed per gate
        "wih": jax.random.uniform(ks[1], (3, hidden_units, hidden_units), jnp.float32,
                                  -scale, scale),
        "whh": jax.random.uniform(ks[2], (3, hidden_units, hidden_units), jnp.float32,
                                  -scale, scale),
        "bih": jax.random.uniform(ks[3], (3, 1, hidden_units), jnp.float32, -scale, scale),
        "bhh": jax.random.uniform(ks[4], (3, 1, hidden_units), jnp.float32, -scale, scale),
        # nn.Linear(H, classes): weight (classes, H) -> stored transposed (H, classes)
        "wout": jax.random.uniform(ks[5], (hidden_units, classes), jnp.float32, -scale, scale),
        "bout": jax.random.uniform(ks[6], (1, classes), jnp.float32, -scale, scale),
    }
    return params


if __name__ == "__main__":
    classes = 16
    hidden_units = 32
    bs = 2
    seq = 16

    key = jax.random.PRNGKey(0)
    k_par, k_x, k_h = jax.random.split(key, 3)

    params = init_params(k_par, classes, hidden_units)
    X = jax.random.randint(k_x, (bs, seq), 0, classes, dtype=jnp.int32)   # token ids
    h0 = jax.random.normal(k_h, (bs, hidden_units), jnp.float32)

    ref = gru_autoregressor_reference(X, h0, params)

    # time_tile=8 -> two chunks (exercises the cross-chunk h_scr carry);
    # time_tile=128 -> single big chunk (the default fast path).
    for tt in (8, 128):
        fwd = jax.jit(
            lambda X, h0, params, tt=tt: gru_autoregressor_forward(
                X, h0, params, time_tile=tt))
        X_logp = fwd(X, h0, params)
        jax.block_until_ready(X_logp)

        assert X_logp.shape == (bs, seq, classes)
        # rows of log_softmax must exponentiate-sum to ~1
        assert bool(jnp.allclose(jnp.sum(jnp.exp(X_logp), axis=-1), 1.0, atol=1e-4))
        # matches the pure-JAX GRU reference (bf16 matmuls, f32 accumulation)
        assert bool(jnp.allclose(X_logp, ref, atol=5e-2, rtol=5e-2))

    print("KERNEL_OK")
</pallas_src>

<mosaic_0001>
module attributes {stable_mosaic.version = 11 : i64} {
  func.func @gru_ar_kernel(%arg0: i32, %arg1: memref<64x1xi32, #tpu.memory_space<vmem>>, %arg2: memref<8x32xf32, #tpu.memory_space<vmem>>, %arg3: memref<16x96xbf16, #tpu.memory_space<vmem>>, %arg4: memref<32x96xbf16, #tpu.memory_space<vmem>>, %arg5: memref<1x96xf32, #tpu.memory_space<vmem>>, %arg6: memref<1x32xf32, #tpu.memory_space<vmem>>, %arg7: memref<32x16xbf16, #tpu.memory_space<vmem>>, %arg8: memref<1x16xf32, #tpu.memory_space<vmem>>, %arg9: memref<64x16xf32, #tpu.memory_space<vmem>>, %arg10: memref<8x32xf32, #tpu.memory_space<vmem>>, %arg11: memref<64x96xf32, #tpu.memory_space<vmem>>, %arg12: memref<64x32xbf16, #tpu.memory_space<vmem>>) attributes {dimension_semantics = [#tpu.dimension_semantics<arbitrary>], iteration_bounds = array<i64: 2>, scalar_prefetch = 0 : i64, scratch_operands = 3 : i64, tpu.core_type = #tpu.core_type<tc>, window_params = [{transform_indices = @transform_0, window_bounds = array<i64: 64, 1>}, {pipeline_mode = #tpu.pipeline_mode<synchronous>, transform_indices = @transform_1, window_bounds = array<i64: 8, 32>}, {pipeline_mode = #tpu.pipeline_mode<synchronous>, transform_indices = @transform_2, window_bounds = array<i64: 16, 96>}, {pipeline_mode = #tpu.pipeline_mode<synchronous>, transform_indices = @transform_3, window_bounds = array<i64: 32, 96>}, {pipeline_mode = #tpu.pipeline_mode<synchronous>, transform_indices = @transform_4, window_bounds = array<i64: 1, 96>}, {pipeline_mode = #tpu.pipeline_mode<synchronous>, transform_indices = @transform_5, window_bounds = array<i64: 1, 32>}, {pipeline_mode = #tpu.pipeline_mode<synchronous>, transform_indices = @transform_6, window_bounds = array<i64: 32, 16>}, {pipeline_mode = #tpu.pipeline_mode<synchronous>, transform_indices = @transform_7, window_bounds = array<i64: 1, 16>}, {transform_indices = @transform_8, window_bounds = array<i64: 64, 16>}]} {
    %c0_i32 = arith.constant 0 : i32
    %0 = arith.cmpi eq, %arg0, %c0_i32 : i32
    %1 = arith.extui %0 : i1 to i32
    %c0_i32_0 = arith.constant 0 : i32
    %2 = arith.cmpi ne, %1, %c0_i32_0 : i32
    scf.if %2 {
      %c0_86 = arith.constant 0 : index
      %c0_87 = arith.constant 0 : index
      %335 = vector.load %arg2[%c0_86, %c0_87] : memref<8x32xf32, #tpu.memory_space<vmem>>, vector<8x32xf32>
      %c0_88 = arith.constant 0 : index
      %c0_89 = arith.constant 0 : index
      %336 = vector.load %arg10[%c0_88, %c0_89] : memref<8x32xf32, #tpu.memory_space<vmem>>, vector<8x32xf32>
      tpu.vector_store %arg10[%c0_88, %c0_89], %335 {strides = array<i32>} : memref<8x32xf32, #tpu.memory_space<vmem>>, vector<8x32xf32>,
    } else {
    }
    %c0 = arith.constant 0 : index
    %c0_1 = arith.constant 0 : index
    %3 = vector.load %arg1[%c0, %c0_1] : memref<64x1xi32, #tpu.memory_space<vmem>>, vector<64x1xi32>
    %4 = tpu.iota {dimensions = array<i32: 1>} : vector<64x16xi32>
    %5 = vector.broadcast %3 : vector<64x1xi32> to vector<64x16xi32>
    %6 = arith.cmpi eq, %5, %4 : vector<64x16xi32>
    %cst = arith.constant 1.000000e+00 : f32
    %cst_2 = arith.constant 0.000000e+00 : f32
    %7 = vector.broadcast %cst : f32 to vector<64x16xf32>
    %8 = vector.broadcast %cst_2 : f32 to vector<64x16xf32>
    %9 = arith.select %6, %7, %8 : vector<64x16xi1>, vector<64x16xf32>
    %10 = arith.truncf %9 : vector<64x16xf32> to vector<64x16xbf16>
    %c0_3 = arith.constant 0 : index
    %c0_4 = arith.constant 0 : index
    %11 = vector.load %arg3[%c0_3, %c0_4] : memref<16x96xbf16, #tpu.memory_space<vmem>>, vector<16x96xbf16>
    %cst_5 = arith.constant dense<0.000000e+00> : vector<64x96xf32>
    %12 = tpu.matmul %10, %11, %cst_5 {dimension_numbers = #tpu.dot_dimension_numbers<[1], [0], [0], [1], [0, 0, 1, 1], [], []>} : vector<64x16xbf16>, vector<16x96xbf16>, vector<64x96xf32> -> vector<64x96xf32>
    %c0_6 = arith.constant 0 : index
    %c0_7 = arith.constant 0 : index
    %13 = vector.load %arg5[%c0_6, %c0_7] : memref<1x96xf32, #tpu.memory_space<vmem>>, vector<1x96xf32>
    %14 = vector.broadcast %13 : vector<1x96xf32> to vector<64x96xf32>
    %15 = arith.addf %12, %14 : vector<64x96xf32>
    %c0_8 = arith.constant 0 : index
    %c0_9 = arith.constant 0 : index
    %16 = vector.load %arg11[%c0_8, %c0_9] : memref<64x96xf32, #tpu.memory_space<vmem>>, vector<64x96xf32>
    tpu.vector_store %arg11[%c0_8, %c0_9], %15 {strides = array<i32>} : memref<64x96xf32, #tpu.memory_space<vmem>>, vector<64x96xf32>,
    %c0_10 = arith.constant 0 : index
    %c0_11 = arith.constant 0 : index
    %17 = vector.load %arg4[%c0_10, %c0_11] : memref<32x96xbf16, #tpu.memory_space<vmem>>, vector<32x96xbf16>
    %c0_12 = arith.constant 0 : index
    %c0_13 = arith.constant 0 : index
    %18 = vector.load %arg6[%c0_12, %c0_13] : memref<1x32xf32, #tpu.memory_space<vmem>>, vector<1x32xf32>
    %c0_14 = arith.constant 0 : index
    %c0_15 = arith.constant 0 : index
    %19 = vector.load %arg10[%c0_14, %c0_15] : memref<8x32xf32, #tpu.memory_space<vmem>>, vector<8x32xf32>
    %c0_i32_16 = arith.constant 0 : i32
    %c8_i32 = arith.constant 8 : i32
    %20 = arith.muli %c0_i32_16, %c8_i32 : i32
    %21 = tpu.assume_multiple %20, 8 : i32
    %22 = arith.truncf %19 : vector<8x32xf32> to vector<8x32xbf16>
    %cst_17 = arith.constant dense<0.000000e+00> : vector<8x96xf32>
    %23 = tpu.matmul %22, %17, %cst_17 {dimension_numbers = #tpu.dot_dimension_numbers<[1], [0], [0], [1], [0, 0, 1, 1], [], []>} : vector<8x32xbf16>, vector<32x96xbf16>, vector<8x96xf32> -> vector<8x96xf32>
    %24 = arith.index_cast %21 : i32 to index
    %c0_18 = arith.constant 0 : index
    %25 = vector.load %arg11[%24, %c0_18] : memref<64x96xf32, #tpu.memory_space<vmem>>, vector<8x96xf32>
    %26 = vector.extract_strided_slice %25 {offsets = [0, 0], sizes = [8, 32], strides = [1, 1]} : vector<8x96xf32> to vector<8x32xf32>
    %27 = vector.extract_strided_slice %23 {offsets = [0, 0], sizes = [8, 32], strides = [1, 1]} : vector<8x96xf32> to vector<8x32xf32>
    %28 = arith.addf %26, %27 : vector<8x32xf32>
    %29 = arith.negf %28 : vector<8x32xf32>
    %30 = math.exp %29 : vector<8x32xf32>
    %cst_19 = arith.constant 1.000000e+00 : f32
    %31 = vector.broadcast %cst_19 : f32 to vector<8x32xf32>
    %32 = arith.addf %31, %30 : vector<8x32xf32>
    %33 = arith.divf %31, %32 : vector<8x32xf32>
    %34 = vector.extract_strided_slice %25 {offsets = [0, 32], sizes = [8, 32], strides = [1, 1]} : vector<8x96xf32> to vector<8x32xf32>
    %35 = vector.extract_strided_slice %23 {offsets = [0, 32], sizes = [8, 32], strides = [1, 1]} : vector<8x96xf32> to vector<8x32xf32>
    %36 = arith.addf %34, %35 : vector<8x32xf32>
    %37 = arith.negf %36 : vector<8x32xf32>
    %38 = math.exp %37 : vector<8x32xf32>
    %cst_20 = arith.constant 1.000000e+00 : f32
    %39 = vector.broadcast %cst_20 : f32 to vector<8x32xf32>
    %40 = arith.addf %39, %38 : vector<8x32xf32>
    %41 = arith.divf %39, %40 : vector<8x32xf32>
    %42 = vector.extract_strided_slice %25 {offsets = [0, 64], sizes = [8, 32], strides = [1, 1]} : vector<8x96xf32> to vector<8x32xf32>
    %43 = vector.extract_strided_slice %23 {offsets = [0, 64], sizes = [8, 32], strides = [1, 1]} : vector<8x96xf32> to vector<8x32xf32>
    %44 = vector.broadcast %18 : vector<1x32xf32> to vector<8x32xf32>
    %45 = arith.addf %43, %44 : vector<8x32xf32>
    %46 = arith.mulf %33, %45 : vector<8x32xf32>
    %47 = arith.addf %42, %46 : vector<8x32xf32>
    %48 = math.tanh %47 : vector<8x32xf32>
    %cst_21 = arith.constant 1.000000e+00 : f32
    %49 = vector.broadcast %cst_21 : f32 to vector<8x32xf32>
    %50 = arith.subf %49, %41 : vector<8x32xf32>
    %51 = arith.mulf %50, %48 : vector<8x32xf32>
    %52 = arith.mulf %41, %19 : vector<8x32xf32>
    %53 = arith.addf %51, %52 : vector<8x32xf32>
    %54 = arith.truncf %53 : vector<8x32xf32> to vector<8x32xbf16>
    %55 = arith.index_cast %21 : i32 to index
    %c0_22 = arith.constant 0 : index
    %56 = vector.load %arg12[%55, %c0_22] : memref<64x32xbf16, #tpu.memory_space<vmem>>, vector<8x32xbf16>
    tpu.vector_store %arg12[%55, %c0_22], %54 {strides = array<i32>} : memref<64x32xbf16, #tpu.memory_space<vmem>>, vector<8x32xbf16>,
    %c1_i32 = arith.constant 1 : i32
    %c8_i32_23 = arith.constant 8 : i32
    %57 = arith.muli %c1_i32, %c8_i32_23 : i32
    %58 = tpu.assume_multiple %57, 8 : i32
    %59 = arith.truncf %53 : vector<8x32xf32> to vector<8x32xbf16>
    %cst_24 = arith.constant dense<0.000000e+00> : vector<8x96xf32>
    %60 = tpu.matmul %59, %17, %cst_24 {dimension_numbers = #tpu.dot_dimension_numbers<[1], [0], [0], [1], [0, 0, 1, 1], [], []>} : vector<8x32xbf16>, vector<32x96xbf16>, vector<8x96xf32> -> vector<8x96xf32>
    %61 = arith.index_cast %58 : i32 to index
    %c0_25 = arith.constant 0 : index
    %62 = vector.load %arg11[%61, %c0_25] : memref<64x96xf32, #tpu.memory_space<vmem>>, vector<8x96xf32>
    %63 = vector.extract_strided_slice %62 {offsets = [0, 0], sizes = [8, 32], strides = [1, 1]} : vector<8x96xf32> to vector<8x32xf32>
    %64 = vector.extract_strided_slice %60 {offsets = [0, 0], sizes = [8, 32], strides = [1, 1]} : vector<8x96xf32> to vector<8x32xf32>
    %65 = arith.addf %63, %64 : vector<8x32xf32>
    %66 = arith.negf %65 : vector<8x32xf32>
    %67 = math.exp %66 : vector<8x32xf32>
    %cst_26 = arith.constant 1.000000e+00 : f32
    %68 = vector.broadcast %cst_26 : f32 to vector<8x32xf32>
    %69 = arith.addf %68, %67 : vector<8x32xf32>
    %70 = arith.divf %68, %69 : vector<8x32xf32>
    %71 = vector.extract_strided_slice %62 {offsets = [0, 32], sizes = [8, 32], strides = [1, 1]} : vector<8x96xf32> to vector<8x32xf32>
    %72 = vector.extract_strided_slice %60 {offsets = [0, 32], sizes = [8, 32], strides = [1, 1]} : vector<8x96xf32> to vector<8x32xf32>
    %73 = arith.addf %71, %72 : vector<8x32xf32>
    %74 = arith.negf %73 : vector<8x32xf32>
    %75 = math.exp %74 : vector<8x32xf32>
    %cst_27 = arith.constant 1.000000e+00 : f32
    %76 = vector.broadcast %cst_27 : f32 to vector<8x32xf32>
    %77 = arith.addf %76, %75 : vector<8x32xf32>
    %78 = arith.divf %76, %77 : vector<8x32xf32>
    %79 = vector.extract_strided_slice %62 {offsets = [0, 64], sizes = [8, 32], strides = [1, 1]} : vector<8x96xf32> to vector<8x32xf32>
    %80 = vector.extract_strided_slice %60 {offsets = [0, 64], sizes = [8, 32], strides = [1, 1]} : vector<8x96xf32> to vector<8x32xf32>
    %81 = vector.broadcast %18 : vector<1x32xf32> to vector<8x32xf32>
    %82 = arith.addf %80, %81 : vector<8x32xf32>
    %83 = arith.mulf %70, %82 : vector<8x32xf32>
    %84 = arith.addf %79, %83 : vector<8x32xf32>
    %85 = math.tanh %84 : vector<8x32xf32>
    %cst_28 = arith.constant 1.000000e+00 : f32
    %86 = vector.broadcast %cst_28 : f32 to vector<8x32xf32>
    %87 = arith.subf %86, %78 : vector<8x32xf32>
    %88 = arith.mulf %87, %85 : vector<8x32xf32>
    %89 = arith.mulf %78, %53 : vector<8x32xf32>
    %90 = arith.addf %88, %89 : vector<8x32xf32>
    %91 = arith.truncf %90 : vector<8x32xf32> to vector<8x32xbf16>
    %92 = arith.index_cast %58 : i32 to index
    %c0_29 = arith.constant 0 : index
    %93 = vector.load %arg12[%92, %c0_29] : memref<64x32xbf16, #tpu.memory_space<vmem>>, vector<8x32xbf16>
    tpu.vector_store %arg12[%92, %c0_29], %91 {strides = array<i32>} : memref<64x32xbf16, #tpu.memory_space<vmem>>, vector<8x32xbf16>,
    %c2_i32 = arith.constant 2 : i32
    %c8_i32_30 = arith.constant 8 : i32
    %94 = arith.muli %c2_i32, %c8_i32_30 : i32
    %95 = tpu.assume_multiple %94, 8 : i32
    %96 = arith.truncf %90 : vector<8x32xf32> to vector<8x32xbf16>
    %cst_31 = arith.constant dense<0.000000e+00> : vector<8x96xf32>
    %97 = tpu.matmul %96, %17, %cst_31 {dimension_numbers = #tpu.dot_dimension_numbers<[1], [0], [0], [1], [0, 0, 1, 1], [], []>} : vector<8x32xbf16>, vector<32x96xbf16>, vector<8x96xf32> -> vector<8x96xf32>
    %98 = arith.index_cast %95 : i32 to index
    %c0_32 = arith.constant 0 : index
    %99 = vector.load %arg11[%98, %c0_32] : memref<64x96xf32, #tpu.memory_space<vmem>>, vector<8x96xf32>
    %100 = vector.extract_strided_slice %99 {offsets = [0, 0], sizes = [8, 32], strides = [1, 1]} : vector<8x96xf32> to vector<8x32xf32>
    %101 = vector.extract_strided_slice %97 {offsets = [0, 0], sizes = [8, 32], strides = [1, 1]} : vector<8x96xf32> to vector<8x32xf32>
    %102 = arith.addf %100, %101 : vector<8x32xf32>
    %103 = arith.negf %102 : vector<8x32xf32>
    %104 = math.exp %103 : vector<8x32xf32>
    %cst_33 = arith.constant 1.000000e+00 : f32
    %105 = vector.broadcast %cst_33 : f32 to vector<8x32xf32>
    %106 = arith.addf %105, %104 : vector<8x32xf32>
    %107 = arith.divf %105, %106 : vector<8x32xf32>
    %108 = vector.extract_strided_slice %99 {offsets = [0, 32], sizes = [8, 32], strides = [1, 1]} : vector<8x96xf32> to vector<8x32xf32>
    %109 = vector.extract_strided_slice %97 {offsets = [0, 32], sizes = [8, 32], strides = [1, 1]} : vector<8x96xf32> to vector<8x32xf32>
    %110 = arith.addf %108, %109 : vector<8x32xf32>
    %111 = arith.negf %110 : vector<8x32xf32>
    %112 = math.exp %111 : vector<8x32xf32>
    %cst_34 = arith.constant 1.000000e+00 : f32
    %113 = vector.broadcast %cst_34 : f32 to vector<8x32xf32>
    %114 = arith.addf %113, %112 : vector<8x32xf32>
    %115 = arith.divf %113, %114 : vector<8x32xf32>
    %116 = vector.extract_strided_slice %99 {offsets = [0, 64], sizes = [8, 32], strides = [1, 1]} : vector<8x96xf32> to vector<8x32xf32>
    %117 = vector.extract_strided_slice %97 {offsets = [0, 64], sizes = [8, 32], strides = [1, 1]} : vector<8x96xf32> to vector<8x32xf32>
    %118 = vector.broadcast %18 : vector<1x32xf32> to vector<8x32xf32>
    %119 = arith.addf %117, %118 : vector<8x32xf32>
    %120 = arith.mulf %107, %119 : vector<8x32xf32>
    %121 = arith.addf %116, %120 : vector<8x32xf32>
    %122 = math.tanh %121 : vector<8x32xf32>
    %cst_35 = arith.constant 1.000000e+00 : f32
    %123 = vector.broadcast %cst_35 : f32 to vector<8x32xf32>
    %124 = arith.subf %123, %115 : vector<8x32xf32>
    %125 = arith.mulf %124, %122 : vector<8x32xf32>
    %126 = arith.mulf %115, %90 : vector<8x32xf32>
    %127 = arith.addf %125, %126 : vector<8x32xf32>
    %128 = arith.truncf %127 : vector<8x32xf32> to vector<8x32xbf16>
    %129 = arith.index_cast %95 : i32 to index
    %c0_36 = arith.constant 0 : index
    %130 = vector.load %arg12[%129, %c0_36] : memref<64x32xbf16, #tpu.memory_space<vmem>>, vector<8x32xbf16>
    tpu.vector_store %arg12[%129, %c0_36], %128 {strides = array<i32>} : memref<64x32xbf16, #tpu.memory_space<vmem>>, vector<8x32xbf16>,
    %c3_i32 = arith.constant 3 : i32
    %c8_i32_37 = arith.constant 8 : i32
    %131 = arith.muli %c3_i32, %c8_i32_37 : i32
    %132 = tpu.assume_multiple %131, 8 : i32
    %133 = arith.truncf %127 : vector<8x32xf32> to vector<8x32xbf16>
    %cst_38 = arith.constant dense<0.000000e+00> : vector<8x96xf32>
    %134 = tpu.matmul %133, %17, %cst_38 {dimension_numbers = #tpu.dot_dimension_numbers<[1], [0], [0], [1], [0, 0, 1, 1], [], []>} : vector<8x32xbf16>, vector<32x96xbf16>, vector<8x96xf32> -> vector<8x96xf32>
    %135 = arith.index_cast %132 : i32 to index
    %c0_39 = arith.constant 0 : index
    %136 = vector.load %arg11[%135, %c0_39] : memref<64x96xf32, #tpu.memory_space<vmem>>, vector<8x96xf32>
    %137 = vector.extract_strided_slice %136 {offsets = [0, 0], sizes = [8, 32], strides = [1, 1]} : vector<8x96xf32> to vector<8x32xf32>
    %138 = vector.extract_strided_slice %134 {offsets = [0, 0], sizes = [8, 32], strides = [1, 1]} : vector<8x96xf32> to vector<8x32xf32>
    %139 = arith.addf %137, %138 : vector<8x32xf32>
    %140 = arith.negf %139 : vector<8x32xf32>
    %141 = math.exp %140 : vector<8x32xf32>
    %cst_40 = arith.constant 1.000000e+00 : f32
    %142 = vector.broadcast %cst_40 : f32 to vector<8x32xf32>
    %143 = arith.addf %142, %141 : vector<8x32xf32>
    %144 = arith.divf %142, %143 : vector<8x32xf32>
    %145 = vector.extract_strided_slice %136 {offsets = [0, 32], sizes = [8, 32], strides = [1, 1]} : vector<8x96xf32> to vector<8x32xf32>
    %146 = vector.extract_strided_slice %134 {offsets = [0, 32], sizes = [8, 32], strides = [1, 1]} : vector<8x96xf32> to vector<8x32xf32>
    %147 = arith.addf %145, %146 : vector<8x32xf32>
    %148 = arith.negf %147 : vector<8x32xf32>
    %149 = math.exp %148 : vector<8x32xf32>
    %cst_41 = arith.constant 1.000000e+00 : f32
    %150 = vector.broadcast %cst_41 : f32 to vector<8x32xf32>
    %151 = arith.addf %150, %149 : vector<8x32xf32>
    %152 = arith.divf %150, %151 : vector<8x32xf32>
    %153 = vector.extract_strided_slice %136 {offsets = [0, 64], sizes = [8, 32], strides = [1, 1]} : vector<8x96xf32> to vector<8x32xf32>
    %154 = vector.extract_strided_slice %134 {offsets = [0, 64], sizes = [8, 32], strides = [1, 1]} : vector<8x96xf32> to vector<8x32xf32>
    %155 = vector.broadcast %18 : vector<1x32xf32> to vector<8x32xf32>
    %156 = arith.addf %154, %155 : vector<8x32xf32>
    %157 = arith.mulf %144, %156 : vector<8x32xf32>
    %158 = arith.addf %153, %157 : vector<8x32xf32>
    %159 = math.tanh %158 : vector<8x32xf32>
    %cst_42 = arith.constant 1.000000e+00 : f32
    %160 = vector.broadcast %cst_42 : f32 to vector<8x32xf32>
    %161 = arith.subf %160, %152 : vector<8x32xf32>
    %162 = arith.mulf %161, %159 : vector<8x32xf32>
    %163 = arith.mulf %152, %127 : vector<8x32xf32>
    %164 = arith.addf %162, %163 : vector<8x32xf32>
    %165 = arith.truncf %164 : vector<8x32xf32> to vector<8x32xbf16>
    %166 = arith.index_cast %132 : i32 to index
    %c0_43 = arith.constant 0 : index
    %167 = vector.load %arg12[%166, %c0_43] : memref<64x32xbf16, #tpu.memory_space<vmem>>, vector<8x32xbf16>
    tpu.vector_store %arg12[%166, %c0_43], %165 {strides = array<i32>} : memref<64x32xbf16, #tpu.memory_space<vmem>>, vector<8x32xbf16>,
    %c4_i32 = arith.constant 4 : i32
    %c8_i32_44 = arith.constant 8 : i32
    %168 = arith.muli %c4_i32, %c8_i32_44 : i32
    %169 = tpu.assume_multiple %168, 8 : i32
    %170 = arith.truncf %164 : vector<8x32xf32> to vector<8x32xbf16>
    %cst_45 = arith.constant dense<0.000000e+00> : vector<8x96xf32>
    %171 = tpu.matmul %170, %17, %cst_45 {dimension_numbers = #tpu.dot_dimension_numbers<[1], [0], [0], [1], [0, 0, 1, 1], [], []>} : vector<8x32xbf16>, vector<32x96xbf16>, vector<8x96xf32> -> vector<8x96xf32>
    %172 = arith.index_cast %169 : i32 to index
    %c0_46 = arith.constant 0 : index
    %173 = vector.load %arg11[%172, %c0_46] : memref<64x96xf32, #tpu.memory_space<vmem>>, vector<8x96xf32>
    %174 = vector.extract_strided_slice %173 {offsets = [0, 0], sizes = [8, 32], strides = [1, 1]} : vector<8x96xf32> to vector<8x32xf32>
    %175 = vector.extract_strided_slice %171 {offsets = [0, 0], sizes = [8, 32], strides = [1, 1]} : vector<8x96xf32> to vector<8x32xf32>
    %176 = arith.addf %174, %175 : vector<8x32xf32>
    %177 = arith.negf %176 : vector<8x32xf32>
    %178 = math.exp %177 : vector<8x32xf32>
    %cst_47 = arith.constant 1.000000e+00 : f32
    %179 = vector.broadcast %cst_47 : f32 to vector<8x32xf32>
    %180 = arith.addf %179, %178 : vector<8x32xf32>
    %181 = arith.divf %179, %180 : vector<8x32xf32>
    %182 = vector.extract_strided_slice %173 {offsets = [0, 32], sizes = [8, 32], strides = [1, 1]} : vector<8x96xf32> to vector<8x32xf32>
    %183 = vector.extract_strided_slice %171 {offsets = [0, 32], sizes = [8, 32], strides = [1, 1]} : vector<8x96xf32> to vector<8x32xf32>
    %184 = arith.addf %182, %183 : vector<8x32xf32>
    %185 = arith.negf %184 : vector<8x32xf32>
    %186 = math.exp %185 : vector<8x32xf32>
    %cst_48 = arith.constant 1.000000e+00 : f32
    %187 = vector.broadcast %cst_48 : f32 to vector<8x32xf32>
    %188 = arith.addf %187, %186 : vector<8x32xf32>
    %189 = arith.divf %187, %188 : vector<8x32xf32>
    %190 = vector.extract_strided_slice %173 {offsets = [0, 64], sizes = [8, 32], strides = [1, 1]} : vector<8x96xf32> to vector<8x32xf32>
    %191 = vector.extract_strided_slice %171 {offsets = [0, 64], sizes = [8, 32], strides = [1, 1]} : vector<8x96xf32> to vector<8x32xf32>
    %192 = vector.broadcast %18 : vector<1x32xf32> to vector<8x32xf32>
    %193 = arith.addf %191, %192 : vector<8x32xf32>
    %194 = arith.mulf %181, %193 : vector<8x32xf32>
    %195 = arith.addf %190, %194 : vector<8x32xf32>
    %196 = math.tanh %195 : vector<8x32xf32>
    %cst_49 = arith.constant 1.000000e+00 : f32
    %197 = vector.broadcast %cst_49 : f32 to vector<8x32xf32>
    %198 = arith.subf %197, %189 : vector<8x32xf32>
    %199 = arith.mulf %198, %196 : vector<8x32xf32>
    %200 = arith.mulf %189, %164 : vector<8x32xf32>
    %201 = arith.addf %199, %200 : vector<8x32xf32>
    %202 = arith.truncf %201 : vector<8x32xf32> to vector<8x32xbf16>
    %203 = arith.index_cast %169 : i32 to index
    %c0_50 = arith.constant 0 : index
    %204 = vector.load %arg12[%203, %c0_50] : memref<64x32xbf16, #tpu.memory_space<vmem>>, vector<8x32xbf16>
    tpu.vector_store %arg12[%203, %c0_50], %202 {strides = array<i32>} : memref<64x32xbf16, #tpu.memory_space<vmem>>, vector<8x32xbf16>,
    %c5_i32 = arith.constant 5 : i32
    %c8_i32_51 = arith.constant 8 : i32
    %205 = arith.muli %c5_i32, %c8_i32_51 : i32
    %206 = tpu.assume_multiple %205, 8 : i32
    %207 = arith.truncf %201 : vector<8x32xf32> to vector<8x32xbf16>
    %cst_52 = arith.constant dense<0.000000e+00> : vector<8x96xf32>
    %208 = tpu.matmul %207, %17, %cst_52 {dimension_numbers = #tpu.dot_dimension_numbers<[1], [0], [0], [1], [0, 0, 1, 1], [], []>} : vector<8x32xbf16>, vector<32x96xbf16>, vector<8x96xf32> -> vector<8x96xf32>
    %209 = arith.index_cast %206 : i32 to index
    %c0_53 = arith.constant 0 : index
    %210 = vector.load %arg11[%209, %c0_53] : memref<64x96xf32, #tpu.memory_space<vmem>>, vector<8x96xf32>
    %211 = vector.extract_strided_slice %210 {offsets = [0, 0], sizes = [8, 32], strides = [1, 1]} : vector<8x96xf32> to vector<8x32xf32>
    %212 = vector.extract_strided_slice %208 {offsets = [0, 0], sizes = [8, 32], strides = [1, 1]} : vector<8x96xf32> to vector<8x32xf32>
    %213 = arith.addf %211, %212 : vector<8x32xf32>
    %214 = arith.negf %213 : vector<8x32xf32>
    %215 = math.exp %214 : vector<8x32xf32>
    %cst_54 = arith.constant 1.000000e+00 : f32
    %216 = vector.broadcast %cst_54 : f32 to vector<8x32xf32>
    %217 = arith.addf %216, %215 : vector<8x32xf32>
    %218 = arith.divf %216, %217 : vector<8x32xf32>
    %219 = vector.extract_strided_slice %210 {offsets = [0, 32], sizes = [8, 32], strides = [1, 1]} : vector<8x96xf32> to vector<8x32xf32>
    %220 = vector.extract_strided_slice %208 {offsets = [0, 32], sizes = [8, 32], strides = [1, 1]} : vector<8x96xf32> to vector<8x32xf32>
    %221 = arith.addf %219, %220 : vector<8x32xf32>
    %222 = arith.negf %221 : vector<8x32xf32>
    %223 = math.exp %222 : vector<8x32xf32>
    %cst_55 = arith.constant 1.000000e+00 : f32
    %224 = vector.broadcast %cst_55 : f32 to vector<8x32xf32>
    %225 = arith.addf %224, %223 : vector<8x32xf32>
    %226 = arith.divf %224, %225 : vector<8x32xf32>
    %227 = vector.extract_strided_slice %210 {offsets = [0, 64], sizes = [8, 32], strides = [1, 1]} : vector<8x96xf32> to vector<8x32xf32>
    %228 = vector.extract_strided_slice %208 {offsets = [0, 64], sizes = [8, 32], strides = [1, 1]} : vector<8x96xf32> to vector<8x32xf32>
    %229 = vector.broadcast %18 : vector<1x32xf32> to vector<8x32xf32>
    %230 = arith.addf %228, %229 : vector<8x32xf32>
    %231 = arith.mulf %218, %230 : vector<8x32xf32>
    %232 = arith.addf %227, %231 : vector<8x32xf32>
    %233 = math.tanh %232 : vector<8x32xf32>
    %cst_56 = arith.constant 1.000000e+00 : f32
    %234 = vector.broadcast %cst_56 : f32 to vector<8x32xf32>
    %235 = arith.subf %234, %226 : vector<8x32xf32>
    %236 = arith.mulf %235, %233 : vector<8x32xf32>
    %237 = arith.mulf %226, %201 : vector<8x32xf32>
    %238 = arith.addf %236, %237 : vector<8x32xf32>
    %239 = arith.truncf %238 : vector<8x32xf32> to vector<8x32xbf16>
    %240 = arith.index_cast %206 : i32 to index
    %c0_57 = arith.constant 0 : index
    %241 = vector.load %arg12[%240, %c0_57] : memref<64x32xbf16, #tpu.memory_space<vmem>>, vector<8x32xbf16>
    tpu.vector_store %arg12[%240, %c0_57], %239 {strides = array<i32>} : memref<64x32xbf16, #tpu.memory_space<vmem>>, vector<8x32xbf16>,
    %c6_i32 = arith.constant 6 : i32
    %c8_i32_58 = arith.constant 8 : i32
    %242 = arith.muli %c6_i32, %c8_i32_58 : i32
    %243 = tpu.assume_multiple %242, 8 : i32
    %244 = arith.truncf %238 : vector<8x32xf32> to vector<8x32xbf16>
    %cst_59 = arith.constant dense<0.000000e+00> : vector<8x96xf32>
    %245 = tpu.matmul %244, %17, %cst_59 {dimension_numbers = #tpu.dot_dimension_numbers<[1], [0], [0], [1], [0, 0, 1, 1], [], []>} : vector<8x32xbf16>, vector<32x96xbf16>, vector<8x96xf32> -> vector<8x96xf32>
    %246 = arith.index_cast %243 : i32 to index
    %c0_60 = arith.constant 0 : index
    %247 = vector.load %arg11[%246, %c0_60] : memref<64x96xf32, #tpu.memory_space<vmem>>, vector<8x96xf32>
    %248 = vector.extract_strided_slice %247 {offsets = [0, 0], sizes = [8, 32], strides = [1, 1]} : vector<8x96xf32> to vector<8x32xf32>
    %249 = vector.extract_strided_slice %245 {offsets = [0, 0], sizes = [8, 32], strides = [1, 1]} : vector<8x96xf32> to vector<8x32xf32>
    %250 = arith.addf %248, %249 : vector<8x32xf32>
    %251 = arith.negf %250 : vector<8x32xf32>
    %252 = math.exp %251 : vector<8x32xf32>
    %cst_61 = arith.constant 1.000000e+00 : f32
    %253 = vector.broadcast %cst_61 : f32 to vector<8x32xf32>
    %254 = arith.addf %253, %252 : vector<8x32xf32>
    %255 = arith.divf %253, %254 : vector<8x32xf32>
    %256 = vector.extract_strided_slice %247 {offsets = [0, 32], sizes = [8, 32], strides = [1, 1]} : vector<8x96xf32> to vector<8x32xf32>
    %257 = vector.extract_strided_slice %245 {offsets = [0, 32], sizes = [8, 32], strides = [1, 1]} : vector<8x96xf32> to vector<8x32xf32>
    %258 = arith.addf %256, %257 : vector<8x32xf32>
    %259 = arith.negf %258 : vector<8x32xf32>
    %260 = math.exp %259 : vector<8x32xf32>
    %cst_62 = arith.constant 1.000000e+00 : f32
    %261 = vector.broadcast %cst_62 : f32 to vector<8x32xf32>
    %262 = arith.addf %261, %260 : vector<8x32xf32>
    %263 = arith.divf %261, %262 : vector<8x32xf32>
    %264 = vector.extract_strided_slice %247 {offsets = [0, 64], sizes = [8, 32], strides = [1, 1]} : vector<8x96xf32> to vector<8x32xf32>
    %265 = vector.extract_strided_slice %245 {offsets = [0, 64], sizes = [8, 32], strides = [1, 1]} : vector<8x96xf32> to vector<8x32xf32>
    %266 = vector.broadcast %18 : vector<1x32xf32> to vector<8x32xf32>
    %267 = arith.addf %265, %266 : vector<8x32xf32>
    %268 = arith.mulf %255, %267 : vector<8x32xf32>
    %269 = arith.addf %264, %268 : vector<8x32xf32>
    %270 = math.tanh %269 : vector<8x32xf32>
    %cst_63 = arith.constant 1.000000e+00 : f32
    %271 = vector.broadcast %cst_63 : f32 to vector<8x32xf32>
    %272 = arith.subf %271, %263 : vector<8x32xf32>
    %273 = arith.mulf %272, %270 : vector<8x32xf32>
    %274 = arith.mulf %263, %238 : vector<8x32xf32>
    %275 = arith.addf %273, %274 : vector<8x32xf32>
    %276 = arith.truncf %275 : vector<8x32xf32> to vector<8x32xbf16>
    %277 = arith.index_cast %243 : i32 to index
    %c0_64 = arith.constant 0 : index
    %278 = vector.load %arg12[%277, %c0_64] : memref<64x32xbf16, #tpu.memory_space<vmem>>, vector<8x32xbf16>
    tpu.vector_store %arg12[%277, %c0_64], %276 {strides = array<i32>} : memref<64x32xbf16, #tpu.memory_space<vmem>>, vector<8x32xbf16>,
    %c7_i32 = arith.constant 7 : i32
    %c8_i32_65 = arith.constant 8 : i32
    %279 = arith.muli %c7_i32, %c8_i32_65 : i32
    %280 = tpu.assume_multiple %279, 8 : i32
    %281 = arith.truncf %275 : vector<8x32xf32> to vector<8x32xbf16>
    %cst_66 = arith.constant dense<0.000000e+00> : vector<8x96xf32>
    %282 = tpu.matmul %281, %17, %cst_66 {dimension_numbers = #tpu.dot_dimension_numbers<[1], [0], [0], [1], [0, 0, 1, 1], [], []>} : vector<8x32xbf16>, vector<32x96xbf16>, vector<8x96xf32> -> vector<8x96xf32>
    %283 = arith.index_cast %280 : i32 to index
    %c0_67 = arith.constant 0 : index
    %284 = vector.load %arg11[%283, %c0_67] : memref<64x96xf32, #tpu.memory_space<vmem>>, vector<8x96xf32>
    %285 = vector.extract_strided_slice %284 {offsets = [0, 0], sizes = [8, 32], strides = [1, 1]} : vector<8x96xf32> to vector<8x32xf32>
    %286 = vector.extract_strided_slice %282 {offsets = [0, 0], sizes = [8, 32], strides = [1, 1]} : vector<8x96xf32> to vector<8x32xf32>
    %287 = arith.addf %285, %286 : vector<8x32xf32>
    %288 = arith.negf %287 : vector<8x32xf32>
    %289 = math.exp %288 : vector<8x32xf32>
    %cst_68 = arith.constant 1.000000e+00 : f32
    %290 = vector.broadcast %cst_68 : f32 to vector<8x32xf32>
    %291 = arith.addf %290, %289 : vector<8x32xf32>
    %292 = arith.divf %290, %291 : vector<8x32xf32>
    %293 = vector.extract_strided_slice %284 {offsets = [0, 32], sizes = [8, 32], strides = [1, 1]} : vector<8x96xf32> to vector<8x32xf32>
    %294 = vector.extract_strided_slice %282 {offsets = [0, 32], sizes = [8, 32], strides = [1, 1]} : vector<8x96xf32> to vector<8x32xf32>
    %295 = arith.addf %293, %294 : vector<8x32xf32>
    %296 = arith.negf %295 : vector<8x32xf32>
    %297 = math.exp %296 : vector<8x32xf32>
    %cst_69 = arith.constant 1.000000e+00 : f32
    %298 = vector.broadcast %cst_69 : f32 to vector<8x32xf32>
    %299 = arith.addf %298, %297 : vector<8x32xf32>
    %300 = arith.divf %298, %299 : vector<8x32xf32>
    %301 = vector.extract_strided_slice %284 {offsets = [0, 64], sizes = [8, 32], strides = [1, 1]} : vector<8x96xf32> to vector<8x32xf32>
    %302 = vector.extract_strided_slice %282 {offsets = [0, 64], sizes = [8, 32], strides = [1, 1]} : vector<8x96xf32> to vector<8x32xf32>
    %303 = vector.broadcast %18 : vector<1x32xf32> to vector<8x32xf32>
    %304 = arith.addf %302, %303 : vector<8x32xf32>
    %305 = arith.mulf %292, %304 : vector<8x32xf32>
    %306 = arith.addf %301, %305 : vector<8x32xf32>
    %307 = math.tanh %306 : vector<8x32xf32>
    %cst_70 = arith.constant 1.000000e+00 : f32
    %308 = vector.broadcast %cst_70 : f32 to vector<8x32xf32>
    %309 = arith.subf %308, %300 : vector<8x32xf32>
    %310 = arith.mulf %309, %307 : vector<8x32xf32>
    %311 = arith.mulf %300, %275 : vector<8x32xf32>
    %312 = arith.addf %310, %311 : vector<8x32xf32>
    %313 = arith.truncf %312 : vector<8x32xf32> to vector<8x32xbf16>
    %314 = arith.index_cast %280 : i32 to index
    %c0_71 = arith.constant 0 : index
    %315 = vector.load %arg12[%314, %c0_71] : memref<64x32xbf16, #tpu.memory_space<vmem>>, vector<8x32xbf16>
    tpu.vector_store %arg12[%314, %c0_71], %313 {strides = array<i32>} : memref<64x32xbf16, #tpu.memory_space<vmem>>, vector<8x32xbf16>,
    %c8_i32_72 = arith.constant 8 : i32
    %c0_73 = arith.constant 0 : index
    %c0_74 = arith.constant 0 : index
    %316 = vector.load %arg10[%c0_73, %c0_74] : memref<8x32xf32, #tpu.memory_space<vmem>>, vector<8x32xf32>
    tpu.vector_store %arg10[%c0_73, %c0_74], %312 {strides = array<i32>} : memref<8x32xf32, #tpu.memory_space<vmem>>, vector<8x32xf32>,
    %c0_75 = arith.constant 0 : index
    %c0_76 = arith.constant 0 : index
    %317 = vector.load %arg12[%c0_75, %c0_76] : memref<64x32xbf16, #tpu.memory_space<vmem>>, vector<64x32xbf16>
    %c0_77 = arith.constant 0 : index
    %c0_78 = arith.constant 0 : index
    %318 = vector.load %arg7[%c0_77, %c0_78] : memref<32x16xbf16, #tpu.memory_space<vmem>>, vector<32x16xbf16>
    %cst_79 = arith.constant dense<0.000000e+00> : vector<64x16xf32>
    %319 = tpu.matmul %317, %318, %cst_79 {dimension_numbers = #tpu.dot_dimension_numbers<[1], [0], [0], [1], [0, 0, 1, 1], [], []>} : vector<64x32xbf16>, vector<32x16xbf16>, vector<64x16xf32> -> vector<64x16xf32>
    %c0_80 = arith.constant 0 : index
    %c0_81 = arith.constant 0 : index
    %320 = vector.load %arg8[%c0_80, %c0_81] : memref<1x16xf32, #tpu.memory_space<vmem>>, vector<1x16xf32>
    %321 = vector.broadcast %320 : vector<1x16xf32> to vector<64x16xf32>
    %322 = arith.addf %319, %321 : vector<64x16xf32>
    %cst_82 = arith.constant dense<0xFF800000> : vector<64xf32>
    %323 = vector.multi_reduction <maximumf>, %322, %cst_82 [1] : vector<64x16xf32> to vector<64xf32>
    %324 = vector.shape_cast %323 : vector<64xf32> to vector<64x1xf32>
    %325 = vector.broadcast %324 : vector<64x1xf32> to vector<64x16xf32>
    %326 = arith.subf %322, %325 : vector<64x16xf32>
    %327 = math.exp %326 : vector<64x16xf32>
    %cst_83 = arith.constant dense<0.000000e+00> : vector<64xf32>
    %328 = vector.multi_reduction <add>, %327, %cst_83 [1] : vector<64x16xf32> to vector<64xf32>
    %329 = vector.shape_cast %328 : vector<64xf32> to vector<64x1xf32>
    %330 = math.log %329 : vector<64x1xf32>
    %331 = arith.addf %330, %324 : vector<64x1xf32>
    %332 = vector.broadcast %331 : vector<64x1xf32> to vector<64x16xf32>
    %333 = arith.subf %322, %332 : vector<64x16xf32>
    %c0_84 = arith.constant 0 : index
    %c0_85 = arith.constant 0 : index
    %334 = vector.load %arg9[%c0_84, %c0_85] : memref<64x16xf32, #tpu.memory_space<vmem>>, vector<64x16xf32>
    tpu.vector_store %arg9[%c0_84, %c0_85], %333 {strides = array<i32>} : memref<64x16xf32, #tpu.memory_space<vmem>>, vector<64x16xf32>,
    return
  }
  func.func @transform_0(%arg0: i32) -> (i32, i32) {
    %c0_i32 = arith.constant 0 : i32
    %c0_i32_0 = arith.constant 0 : i32
    return %arg0, %c0_i32 : i32, i32
  }
  func.func @transform_1(%arg0: i32) -> (i32, i32) {
    %c0_i32 = arith.constant 0 : i32
    %c0_i32_0 = arith.constant 0 : i32
    %c0_i32_1 = arith.constant 0 : i32
    return %c0_i32, %c0_i32_0 : i32, i32
  }
  func.func @transform_2(%arg0: i32) -> (i32, i32) {
    %c0_i32 = arith.constant 0 : i32
    %c0_i32_0 = arith.constant 0 : i32
    %c0_i32_1 = arith.constant 0 : i32
    return %c0_i32, %c0_i32_0 : i32, i32
  }
  func.func @transform_3(%arg0: i32) -> (i32, i32) {
    %c0_i32 = arith.constant 0 : i32
    %c0_i32_0 = arith.constant 0 : i32
    %c0_i32_1 = arith.constant 0 : i32
    return %c0_i32, %c0_i32_0 : i32, i32
  }
  func.func @transform_4(%arg0: i32) -> (i32, i32) {
    %c0_i32 = arith.constant 0 : i32
    %c0_i32_0 = arith.constant 0 : i32
    %c0_i32_1 = arith.constant 0 : i32
    return %c0_i32, %c0_i32_0 : i32, i32
  }
  func.func @transform_5(%arg0: i32) -> (i32, i32) {
    %c0_i32 = arith.constant 0 : i32
    %c0_i32_0 = arith.constant 0 : i32
    %c0_i32_1 = arith.constant 0 : i32
    return %c0_i32, %c0_i32_0 : i32, i32
  }
  func.func @transform_6(%arg0: i32) -> (i32, i32) {
    %c0_i32 = arith.constant 0 : i32
    %c0_i32_0 = arith.constant 0 : i32
    %c0_i32_1 = arith.constant 0 : i32
    return %c0_i32, %c0_i32_0 : i32, i32
  }
  func.func @transform_7(%arg0: i32) -> (i32, i32) {
    %c0_i32 = arith.constant 0 : i32
    %c0_i32_0 = arith.constant 0 : i32
    %c0_i32_1 = arith.constant 0 : i32
    return %c0_i32, %c0_i32_0 : i32, i32
  }
  func.func @transform_8(%arg0: i32) -> (i32, i32) {
    %c0_i32 = arith.constant 0 : i32
    %c0_i32_0 = arith.constant 0 : i32
    return %arg0, %c0_i32 : i32, i32
  }
}

</mosaic_0001>

<bundles_post_ra>
// kernel: _lambda_.1
= control target key start
LH: loop header
LB: loop body
LE: loop exit
PB: predicated region body
PF: predicated region fallthrough
CT: control target
= control target key end

     0   :  { %s1510_s27 = smov 0   ;;  %s1830_s0 = inlined_call_operand.vmem [shape: s32[128,1], index: 0, kind: input, shape index: {}]   ;;  %s1831_s1 = inlined_call_operand.vmem [shape: f32[8,32], index: 1, kind: input, shape index: {}]   ;;  %s1832_s2 = inlined_call_operand.vmem [shape: bf16[16,96], index: 2, kind: input, shape index: {}]   ;;  %s1833_s3 = inlined_call_operand.vmem [shape: bf16[32,96], index: 3, kind: input, shape index: {}]   ;;  %s1834_s4 = inlined_call_operand.vmem [shape: f32[1,96], index: 4, kind: input, shape index: {}]   ;;  %s1835_s5 = inlined_call_operand.vmem [shape: f32[1,32], index: 5, kind: input, shape index: {}]   ;;  %s1836_s6 = inlined_call_operand.vmem [shape: bf16[32,16], index: 6, kind: input, shape index: {}]   ;;  %s1837_s7 = inlined_call_operand.vmem [shape: f32[1,16], index: 7, kind: input, shape index: {}]   ;;  %s1838_s8 = inlined_call_operand.vmem [shape: f32[128,16], index: 8, kind: output, shape index: {}]  }
   0x1 LB: > { %s1272_s28 = sadd.s32 4294967295, %s1458_s27   ;;  %p1276_p0 = scmp.ge.s32.totalorder %s1458_s27, 1  ;;  %s1458_s27 = sphi %s1510_s27, %s18_s27  }
   0x2   : > { %p263_p1 = scmp.lt.s32.totalorder %s1458_s27, 3 }
   0x4   : > { %p264_p2 = pnand %p1276_p0, %p263_p1 }
   0x5   : > { %s1277_s29 = sshll.u32 (!%p264_p2), %s1272_s28, 3  ;;  %p1281_p4 = scmp.ne.s32.totalorder (!%p264_p2), %s1272_s28, 0 }
   0x6   : > { %267 = sbr.rel (%p264_p2) target bundleno = 5131 (0x140b), region = 52  ;;  %p298_p3 = scmp.lt.s32.totalorder (!%p264_p2), %s1277_s29, 15 }
   0xb   : > { %s1840_s29 = smov (!%p298_p3, %s1277_s29), 15  ;;  %313 = sbr.rel (%p1281_p4) target bundleno = 18 (0x12), region = 56 }
   0xc   : > { %s1278_s30 = sshll.u32 %s1840_s29, 3 }
   0xd   : > { %s1521_s11 = scalar_lea.vmem %s1830_s0, %s1278_s30  ;;  %s1526_s14 = scalar_lea.vmem %s1838_s8, %s1278_s30 }
  0x10   : > { %v314_v0 = vld [vmem:[%s1831_s1] sm:$0xff]  ;;  %vm315_vm0 = vcmask 261120  }
  0x11   : > { %316 = vst.msk [vmem:[#allocation2] sm:$0xff] %vm315_vm0, %v314_v0 }
  0x12 PF: > { %v317_v1 = vld [vmem:[%s1521_s11] sm:$0xff]  ;;  %v1535_v2 = vld [vmem:[%s1833_s3 + $0x8] sm:$0xff]  ;;  %v1460_v3 = vmov 0   ;;  %s1461_s23 = smov 64   ;;  %vm453_vm1 = vcmask 261120   ;;  %s1462_s24 = smov 32   ;;  %v325_v10 = vlaneseq }
  0x13   : > { %1366 = vset.pattern.permute.xlu0 %v1460_v3  ;;  %v1540_v4 = vld [vmem:[%s1833_s3] sm:$0xff]  ;;  %1367 = vset.pattern.permute.xlu2 %v1460_v3  ;;  %v318_v8 = vld [vmem:[%s1521_s11 + $0x8] sm:$0xff]  ;;  %v1463_v14 = vmov 0.0   ;;  %vm383_vm4 = vcmask 130048   ;;  %vm425_vm5 = vcmask 785408   ;;  %s1464_s30 = smov 96  }
  0x14   : > { %328 = vperm.xlu0 %1366, %v317_v1   ;;  %463 = vmatpush.bf16.msra.mxu1 %v1535_v2  ;;  %v1369_v6 = vld [vmem:[%s1835_s5] ss:$0 sm:$0xff]  ;;  %v1561_v12 = vand.u32 127, %v325_v10 }
  0x15   : > { %540 = vmatpush.bf16.msra.mxu2 %v1535_v2  ;;  %1368 = vset.pattern.permute.xlu1 %v1460_v3  ;;  %v1344_v9 = vld [vmem:[%s1832_s2] sm:$0xff]  ;;  %v319_v3 = vld [vmem:[%s1521_s11 + $0x10] sm:$0xff] }
  0x16   : > { %493 = vrot.lane.b32.xlu1 %v1369_v6, %s1461_s23  ;;  %403 = vmatpush.bf16.msra.mxu0 %v1344_v9  ;;  %v1575_v22 = vld [vmem:[%s1834_s4] ss:$0 sm:$0xff] }
  0x18   : > { %v439_v5 = vld [vmem:[#allocation2] sm:$0xff]  ;;  %464 = vmatpush.bf16.msra.mxu1 %v1540_v4 }
  0x19   : > { %v440_v7 = vpack.c.bf16 %v439_v5, %v439_v5  ;;  %541 = vmatpush.bf16.msra.mxu2 %v1540_v4 }
  0x1b   : > { %1298 = vmatmul.msk.bf16.vlgmr.msra.gmra.mxu1 %vm453_vm1, %v440_v7 }
  0x1c   : > { %609 = vmatpush.bf16.msrb.mxu1 %v1535_v2  ;;  %331 = vperm.xlu0 %1366, %v318_v8  }
  0x1d   : > { %747 = vmatpush.bf16.msrb.mxu2 %v1535_v2 }
  0x20   : > { %610 = vmatpush.bf16.msrb.mxu1 %v1540_v4 }
  0x21   : > { %748 = vmatpush.bf16.msrb.mxu2 %v1540_v4 }
  0x24   : > { %678 = vmatpush.bf16.msra.mxu1 %v1535_v2  ;;  %515 = vrot.lane.b32.xlu0 %v439_v5, %s1462_s24 }
  0x28   : > { %679 = vmatpush.bf16.msra.mxu1 %v1540_v4 }
  0x86   : > { %v329_v11 = vpop.permute.xlu0 %328 }
  0x87   : > { %vm351_vm2 = vcmp.eq.s32.totalorder %v329_v11, %v1561_v12 }
  0x88   : > { %v359_v15 = vsel %vm351_vm2, 1.0, %v1463_v14  ;;  %v1568_v18 = vpop.permute.xlu1 %493 }
  0x8e   : > { %v332_v13 = vpop.permute.xlu0 %331 }
  0x8f   : > { %vm352_vm3 = vcmp.eq.s32.totalorder %v332_v13, %v1561_v12 }
  0x90   : > { %v360_v16 = vsel %vm352_vm3, 1.0, %v1463_v14 }
  0x91   : > { %v367_v17 = vpack.c.bf16 %v360_v16, %v359_v15 }
  0x93   : > { %1286 = vmatmul.msk.bf16.vlgmr.msra.gmra.mxu0 %vm383_vm4, %v367_v17 }
  0x96   : > { %v516_v47 = vpop.permute.xlu0 %515 }
  0x98   : > { %v466_v19 = vpop.f32.mrf.mxu1 }
  0x99   : > { %v496_v20 = vadd.f32 %v1568_v18, %v466_v19 }
  0x9b   : > { %498 = vrot.lane.b32.xlu1 %v496_v20, %s1461_s23 }
  0xa0   : > { %v468_v21 = vpop.f32.mrf.mxu1 }
 0x10d   : > { %v499_v39 = vpop.permute.xlu1 %498 }
 0x110   : > { %v405_v23 = vpop.f32.mrf.mxu0 }
 0x111   : > { %v406_v24 = vadd.f32 %v1575_v22, %v405_v23 }
 0x113   : > { %426 = vst.msk [vmem:[#allocation3] sm:$0xff] %vm425_vm5, %v406_v24 }
 0x118   : > { %v407_v25 = vpop.f32.mrf.mxu0 }
 0x119   : > { %v408_v26 = vadd.f32 %v1575_v22, %v407_v25 }
 0x11a   : > { %v470_v27 = vld [vmem:[#allocation3] sm:$0xff] }
 0x11b   : > { %427 = vst.msk [vmem:[#allocation3 + $0x8] sm:$0xff] %vm425_vm5, %v408_v26  ;;  %v471_v28 = vadd.f32 %v470_v27, %v466_v19  ;;  %v320_v19 = vld [vmem:[%s1521_s11 + $0x18] sm:$0xff] }
 0x11d   : > { %v1299_v29 = vmul.f32 -1.442695, %v471_v28 }
 0x11f   : > { %1372 = vpow2.f32 %v1299_v29 }
 0x122   : > { %v548_v60 = vld [vmem:[#allocation3 + $0x8] sm:$0xff] }
 0x125   : > { %v1373_v30 = vpop.eup %1372 }
 0x126   : > { %v475_v31 = vadd.f32 1.0, %v1373_v30 }
 0x128   : > { %1374 = vrcp.f32 %v475_v31  ;;  %v487_v35 = vand.u32 2147483648, %v475_v31  ;;  %v485_v37 = vand.u32 2147483647, %v475_v31  ;;  %vm481_vm7 = vweird.f32 %v475_v31 }
 0x12a   : > { %v488_v40 = vor.u32 1.1754944e-38, %v487_v35  ;;  %vm486_vm9 = vcmp.eq.f32.partialorder %v485_v37, 8.507059e+37 }
 0x12e   : > { %v1375_v32 = vpop.eup %1374 }
 0x12f   : > { %v477_v33 = vmul.f32 %v1375_v32, %v475_v31  ;;  %vm482_vm6 = vweird.f32 %v1375_v32 }
 0x130   : > { %vm483_vm8 = vmor %vm481_vm7, %vm482_vm6 }
 0x131   : > { %v478_v34 = vsub.f32 1.0, %v477_v33 }
 0x133   : > { %v479_v36 = vmul.f32 %v1375_v32, %v478_v34 }
 0x135   : > { %v480_v38 = vadd.f32 %v1375_v32, %v479_v36 }
 0x137   : > { %v484_v41 = vsel %vm483_vm8, %v1375_v32, %v480_v38 }
 0x138   : > { %v489_v42 = vsel %vm486_vm9, %v488_v40, %v484_v41 }
 0x139   : > { %v501_v43 = vmul.f32 %v499_v39, %v489_v42  ;;  %v508_v48 = vsub.f32 1.0, %v489_v42  ;;  %v518_v50 = vmul.f32 %v516_v47, %v489_v42 }
 0x13b   : > { %503 = vrot.lane.b32.xlu2 %v501_v43, %s1461_s23 }
 0x195   : > { %v504_v44 = vpop.permute.xlu2 %503 }
 0x196   : > { %v506_v45 = vadd.f32 %v504_v44, %v470_v27 }
 0x198   : > { %1376 = vtanh.f32 %v506_v45 }
 0x19e   : > { %v1377_v46 = vpop.eup %1376 }
 0x19f   : > { %510 = vrot.lane.b32.xlu2 %v1377_v46, %s1464_s30 }
 0x1f9   : > { %v511_v49 = vpop.permute.xlu2 %510 }
 0x1fa   : > { %v513_v51 = vmul.f32 %v511_v49, %v508_v48 }
 0x1fc   : > { %v519_v52 = vadd.f32 %v518_v50, %v513_v51 }
 0x1fe   : > { %v1583_v53 = vpack.c.bf16 %v519_v52, %v519_v52 }
 0x200   : > { %v527_v54 = vunpack.c.l.b16 %v1583_v53 }
 0x202   : > { %v528_v55 = vpack.c.b16 %v527_v54, %v527_v54 }
 0x204   : > { %529 = vrot.lane.b32.xlu1 %v528_v55, %s1464_s30 }
 0x276   : > { %v530_v56 = vpop.permute.xlu1 %529 }
 0x277   : > { %1300 = vmatmul.msk.bf16.vlgmr.msra.gmra.mxu2 %vm453_vm1, %v530_v56 }
 0x278   : > { %816 = vmatpush.bf16.msra.mxu2 %v1535_v2 }
 0x27c   : > { %817 = vmatpush.bf16.msra.mxu2 %v1540_v4 }
 0x2fa   : > { %v543_v57 = vpop.f32.mrf.mxu2 }
 0x2fb   : > { %v569_v58 = vadd.f32 %v543_v57, %v1568_v18  ;;  %v549_v61 = vadd.f32 %v548_v60, %v543_v57 }
 0x2fd   : > { %571 = vrot.lane.b32.xlu2 %v569_v58, %s1461_s23  ;;  %v1301_v62 = vmul.f32 -1.442695, %v549_v61 }
 0x2ff   : > { %1378 = vpow2.f32 %v1301_v62 }
 0x302   : > { %v545_v59 = vpop.f32.mrf.mxu2 }
 0x305   : > { %v1379_v63 = vpop.eup %1378  ;;  %334 = vperm.xlu2 %1367, %v319_v3  }
 0x306   : > { %v553_v0 = vadd.f32 1.0, %v1379_v63 }
 0x308   : > { %1380 = vrcp.f32 %v553_v0  ;;  %v565_v9 = vand.u32 2147483648, %v553_v0  ;;  %vm559_vm11 = vweird.f32 %v553_v0  ;;  %v563_v10 = vand.u32 2147483647, %v553_v0 }
 0x30a   : > { %v566_v13 = vor.u32 1.1754944e-38, %v565_v9  ;;  %vm564_vm13 = vcmp.eq.f32.partialorder %v563_v10, 8.507059e+37 }
 0x30e   : > { %v1381_v1 = vpop.eup %1380 }
 0x30f   : > { %v555_v5 = vmul.f32 %v1381_v1, %v553_v0  ;;  %vm560_vm10 = vweird.f32 %v1381_v1 }
 0x310   : > { %vm561_vm12 = vmor %vm559_vm11, %vm560_vm10 }
 0x311   : > { %v556_v6 = vsub.f32 1.0, %v555_v5 }
 0x313   : > { %v557_v7 = vmul.f32 %v1381_v1, %v556_v6 }
 0x315   : > { %v558_v8 = vadd.f32 %v1381_v1, %v557_v7 }
 0x317   : > { %v562_v11 = vsel %vm561_vm12, %v1381_v1, %v558_v8 }
 0x318   : > { %v567_v16 = vsel %vm564_vm13, %v566_v13, %v562_v11 }
 0x319   : > { %v581_v29 = vsub.f32 1.0, %v567_v16  ;;  %v587_v31 = vmul.f32 %v567_v16, %v519_v52 }
 0x357   : > { %v572_v15 = vpop.permute.xlu2 %571 }
 0x358   : > { %v574_v17 = vmul.f32 %v572_v15, %v567_v16 }
 0x35a   : > { %576 = vrot.lane.b32.xlu0 %v574_v17, %s1461_s23 }
 0x35f   : > { %v335_v23 = vpop.permute.xlu2 %334 }
 0x360   : > { %vm353_vm14 = vcmp.eq.s32.totalorder %v335_v23, %v1561_v12 }
 0x361   : > { %v361_v24 = vsel %vm353_vm14, 1.0, %v1463_v14 }
 0x362   : > { %337 = vperm.xlu0 %1366, %v320_v19  }
 0x3cc   : > { %v577_v20 = vpop.permute.xlu0 %576 }
 0x3cd   : > { %v579_v21 = vadd.f32 %v577_v20, %v548_v60 }
 0x3cf   : > { %1382 = vtanh.f32 %v579_v21 }
 0x3d4   : > { %v338_v25 = vpop.permute.xlu0 %337 }
 0x3d5   : > { %v1383_v26 = vpop.eup %1382  ;;  %vm354_vm15 = vcmp.eq.s32.totalorder %v338_v25, %v1561_v12 }
 0x3d6   : > { %v362_v27 = vsel %vm354_vm15, 1.0, %v1463_v14  ;;  %583 = vrot.lane.b32.xlu1 %v1383_v26, %s1464_s30 }
 0x3d7   : > { %v368_v28 = vpack.c.bf16 %v362_v27, %v361_v24 }
 0x3d9   : > { %1287 = vmatmul.msk.bf16.gmra.mxu0 %vm383_vm4, %v368_v28 }
 0x448   : > { %v584_v30 = vpop.permute.xlu1 %583 }
 0x449   : > { %v586_v32 = vmul.f32 %v584_v30, %v581_v29 }
 0x44b   : > { %v588_v33 = vadd.f32 %v587_v31, %v586_v32 }
 0x44d   : > { %v1601_v34 = vpack.c.bf16 %v588_v33, %v588_v33 }
 0x44f   : > { %v596_v35 = vunpack.c.l.b16 %v1601_v34 }
 0x451   : > { %v597_v36 = vpack.c.b16 %v596_v35, %v596_v35 }
 0x453   : > { %598 = vrot.lane.b32.xlu1 %v597_v36, %s1464_s30 }
 0x456   : > { %v410_v37 = vpop.f32.mrf.mxu0 }
 0x457   : > { %v411_v38 = vadd.f32 %v1575_v22, %v410_v37 }
 0x459   : > { %428 = vst.msk [vmem:[#allocation3 + $0x10] sm:$0xff] %vm425_vm5, %v411_v38  ;;  %v321_v38 = vld [vmem:[%s1521_s11 + $0x20] sm:$0xff] }
 0x45e   : > { %v412_v39 = vpop.f32.mrf.mxu0 }
 0x45f   : > { %v413_v40 = vadd.f32 %v1575_v22, %v412_v39 }
 0x460   : > { %v617_v45 = vld [vmem:[#allocation3 + $0x10] sm:$0xff] }
 0x461   : > { %429 = vst.msk [vmem:[#allocation3 + $0x18] sm:$0xff] %vm425_vm5, %v413_v40 }
 0x468   : > { %v686_v19 = vld [vmem:[#allocation3 + $0x18] sm:$0xff] }
 0x4c5   : > { %v599_v41 = vpop.permute.xlu1 %598 }
 0x4c6   : > { %1302 = vmatmul.msk.bf16.vlgmr.msrb.gmra.mxu1 %vm453_vm1, %v599_v41 }
 0x4c7   : > { %885 = vmatpush.bf16.msrb.mxu1 %v1535_v2 }
 0x4cb   : > { %886 = vmatpush.bf16.msrb.mxu1 %v1540_v4 }
 0x543   : > { %v612_v42 = vpop.f32.mrf.mxu1 }
 0x544   : > { %v638_v43 = vadd.f32 %v612_v42, %v1568_v18  ;;  %v618_v46 = vadd.f32 %v617_v45, %v612_v42  ;;  %v322_v42 = vld [vmem:[%s1521_s11 + $0x28] sm:$0xff] }
 0x546   : > { %640 = vrot.lane.b32.xlu2 %v638_v43, %s1461_s23  ;;  %v1303_v47 = vmul.f32 -1.442695, %v618_v46 }
 0x548   : > { %1384 = vpow2.f32 %v1303_v47 }
 0x54b   : > { %v614_v44 = vpop.f32.mrf.mxu1 }
 0x54e   : > { %v1385_v48 = vpop.eup %1384 }
 0x54f   : > { %v622_v49 = vadd.f32 1.0, %v1385_v48 }
 0x551   : > { %1386 = vrcp.f32 %v622_v49  ;;  %v634_v56 = vand.u32 2147483648, %v622_v49  ;;  %vm628_vm2 = vweird.f32 %v622_v49  ;;  %v632_v57 = vand.u32 2147483647, %v622_v49 }
 0x553   : > { %v635_v59 = vor.u32 1.1754944e-38, %v634_v56  ;;  %vm633_vm6 = vcmp.eq.f32.partialorder %v632_v57, 8.507059e+37 }
 0x557   : > { %v1387_v50 = vpop.eup %1386 }
 0x558   : > { %v624_v51 = vmul.f32 %v1387_v50, %v622_v49  ;;  %vm629_vm0 = vweird.f32 %v1387_v50 }
 0x559   : > { %vm630_vm3 = vmor %vm628_vm2, %vm629_vm0 }
 0x55a   : > { %v625_v52 = vsub.f32 1.0, %v624_v51 }
 0x55c   : > { %v626_v54 = vmul.f32 %v1387_v50, %v625_v52 }
 0x55e   : > { %v627_v55 = vadd.f32 %v1387_v50, %v626_v54 }
 0x560   : > { %v631_v58 = vsel %vm630_vm3, %v1387_v50, %v627_v55 }
 0x561   : > { %v636_v61 = vsel %vm633_vm6, %v635_v59, %v631_v58 }
 0x562   : > { %v650_v3 = vsub.f32 1.0, %v636_v61  ;;  %v656_v6 = vmul.f32 %v636_v61, %v588_v33 }
 0x5a0   : > { %v641_v60 = vpop.permute.xlu2 %640 }
 0x5a1   : > { %v643_v62 = vmul.f32 %v641_v60, %v636_v61 }
 0x5a3   : > { %645 = vrot.lane.b32.xlu0 %v643_v62, %s1461_s23 }
 0x615   : > { %v646_v63 = vpop.permute.xlu0 %645 }
 0x616   : > { %v648_v0 = vadd.f32 %v646_v63, %v617_v45 }
 0x618   : > { %1388 = vtanh.f32 %v648_v0 }
 0x61e   : > { %v1389_v1 = vpop.eup %1388 }
 0x61f   : > { %652 = vrot.lane.b32.xlu1 %v1389_v1, %s1464_s30 }
 0x691   : > { %v653_v5 = vpop.permute.xlu1 %652 }
 0x692   : > { %v655_v7 = vmul.f32 %v653_v5, %v650_v3 }
 0x694   : > { %v657_v8 = vadd.f32 %v656_v6, %v655_v7 }
 0x696   : > { %v1616_v9 = vpack.c.bf16 %v657_v8, %v657_v8 }
 0x698   : > { %v665_v10 = vunpack.c.l.b16 %v1616_v9 }
 0x69a   : > { %v666_v11 = vpack.c.b16 %v665_v10, %v665_v10 }
 0x69c   : > { %667 = vrot.lane.b32.xlu2 %v666_v11, %s1464_s30 }
 0x6f6   : > { %v668_v13 = vpop.permute.xlu2 %667 }
 0x6f7   : > { %1304 = vmatmul.msk.bf16.vlgmr.msra.gmra.mxu1 %vm453_vm1, %v668_v13 }
 0x774   : > { %v681_v15 = vpop.f32.mrf.mxu1 }
 0x775   : > { %v707_v16 = vadd.f32 %v681_v15, %v1568_v18  ;;  %v687_v20 = vadd.f32 %v686_v19, %v681_v15 }
 0x777   : > { %709 = vrot.lane.b32.xlu0 %v707_v16, %s1461_s23  ;;  %v1305_v21 = vmul.f32 -1.442695, %v687_v20 }
 0x779   : > { %1390 = vpow2.f32 %v1305_v21 }
 0x77c   : > { %v683_v17 = vpop.f32.mrf.mxu1 }
 0x77f   : > { %v1391_v23 = vpop.eup %1390 }
 0x780   : > { %v691_v24 = vadd.f32 1.0, %v1391_v23 }
 0x782   : > { %1392 = vrcp.f32 %v691_v24  ;;  %v703_v30 = vand.u32 2147483648, %v691_v24  ;;  %vm697_vm8 = vweird.f32 %v691_v24  ;;  %v701_v31 = vand.u32 2147483647, %v691_v24 }
 0x784   : > { %v704_v33 = vor.u32 1.1754944e-38, %v703_v30  ;;  %vm702_vm10 = vcmp.eq.f32.partialorder %v701_v31, 8.507059e+37 }
 0x788   : > { %v1393_v25 = vpop.eup %1392 }
 0x789   : > { %v693_v26 = vmul.f32 %v1393_v25, %v691_v24  ;;  %vm698_vm7 = vweird.f32 %v1393_v25 }
 0x78a   : > { %vm699_vm9 = vmor %vm697_vm8, %vm698_vm7 }
 0x78b   : > { %v694_v27 = vsub.f32 1.0, %v693_v26 }
 0x78d   : > { %v695_v28 = vmul.f32 %v1393_v25, %v694_v27 }
 0x78f   : > { %v696_v29 = vadd.f32 %v1393_v25, %v695_v28 }
 0x791   : > { %v700_v32 = vsel %vm699_vm9, %v1393_v25, %v696_v29 }
 0x792   : > { %v705_v36 = vsel %vm702_vm10, %v704_v33, %v700_v32 }
 0x793   : > { %v719_v43 = vsub.f32 1.0, %v705_v36  ;;  %v725_v45 = vmul.f32 %v705_v36, %v657_v8 }
 0x7e9   : > { %v710_v35 = vpop.permute.xlu0 %709 }
 0x7ea   : > { %v712_v37 = vmul.f32 %v710_v35, %v705_v36 }
 0x7ec   : > { %714 = vrot.lane.b32.xlu1 %v712_v37, %s1461_s23 }
 0x7f4   : > { %340 = vperm.xlu1 %1368, %v321_v38  }
 0x85e   : > { %v715_v39 = vpop.permute.xlu1 %714 }
 0x85f   : > { %v717_v40 = vadd.f32 %v715_v39, %v686_v19  ;;  %v323_v39 = vld [vmem:[%s1521_s11 + $0x30] sm:$0xff] }
 0x861   : > { %1394 = vtanh.f32 %v717_v40 }
 0x866   : > { %v341_v47 = vpop.permute.xlu1 %340 }
 0x867   : > { %v1395_v41 = vpop.eup %1394  ;;  %vm355_vm11 = vcmp.eq.s32.totalorder %v341_v47, %v1561_v12 }
 0x868   : > { %721 = vrot.lane.b32.xlu2 %v1395_v41, %s1464_s30  ;;  %v363_v52 = vsel %vm355_vm11, 1.0, %v1463_v14 }
 0x870   : > { %343 = vperm.xlu2 %1367, %v322_v42  }
 0x8c2   : > { %v722_v44 = vpop.permute.xlu2 %721 }
 0x8c3   : > { %v724_v46 = vmul.f32 %v722_v44, %v719_v43 }
 0x8c5   : > { %v726_v48 = vadd.f32 %v725_v45, %v724_v46 }
 0x8c7   : > { %v1627_v49 = vpack.c.bf16 %v726_v48, %v726_v48 }
 0x8c9   : > { %v734_v50 = vunpack.c.l.b16 %v1627_v49 }
 0x8ca   : > { %v344_v51 = vpop.permute.xlu2 %343 }
 0x8cb   : > { %vm356_vm12 = vcmp.eq.s32.totalorder %v344_v51, %v1561_v12  ;;  %v735_v54 = vpack.c.b16 %v734_v50, %v734_v50 }
 0x8cc   : > { %v364_v55 = vsel %vm356_vm12, 1.0, %v1463_v14 }
 0x8cd   : > { %v369_v56 = vpack.c.bf16 %v364_v55, %v363_v52  ;;  %736 = vrot.lane.b32.xlu0 %v735_v54, %s1464_s30 }
 0x8cf   : > { %1288 = vmatmul.msk.bf16.gmra.mxu0 %vm383_vm4, %v369_v56 }
 0x93f   : > { %v737_v57 = vpop.permute.xlu0 %736 }
 0x940   : > { %1306 = vmatmul.msk.bf16.vlgmr.msrb.gmra.mxu2 %vm453_vm1, %v737_v57 }
 0x941   : > { %954 = vmatpush.bf16.msrb.mxu2 %v1535_v2 }
 0x945   : > { %955 = vmatpush.bf16.msrb.mxu2 %v1540_v4 }
 0x94c   : > { %v415_v58 = vpop.f32.mrf.mxu0 }
 0x94d   : > { %v416_v59 = vadd.f32 %v1575_v22, %v415_v58 }
 0x94f   : > { %430 = vst.msk [vmem:[#allocation3 + $0x20] sm:$0xff] %vm425_vm5, %v416_v59  ;;  %v324_v59 = vld [vmem:[%s1521_s11 + $0x38] sm:$0xff] }
 0x954   : > { %v417_v60 = vpop.f32.mrf.mxu0 }
 0x955   : > { %v418_v61 = vadd.f32 %v1575_v22, %v417_v60 }
 0x956   : > { %v755_v1 = vld [vmem:[#allocation3 + $0x20] sm:$0xff] }
 0x957   : > { %431 = vst.msk [vmem:[#allocation3 + $0x28] sm:$0xff] %vm425_vm5, %v418_v61 }
 0x95e   : > { %v824_v40 = vld [vmem:[#allocation3 + $0x28] sm:$0xff] }
 0x9c3   : > { %v750_v62 = vpop.f32.mrf.mxu2 }
 0x9c4   : > { %v776_v63 = vadd.f32 %v750_v62, %v1568_v18  ;;  %v756_v2 = vadd.f32 %v755_v1, %v750_v62 }
 0x9c6   : > { %778 = vrot.lane.b32.xlu0 %v776_v63, %s1461_s23  ;;  %v1307_v3 = vmul.f32 -1.442695, %v756_v2 }
 0x9c8   : > { %1396 = vpow2.f32 %v1307_v3 }
 0x9cb   : > { %v752_v0 = vpop.f32.mrf.mxu2 }
 0x9ce   : > { %v1397_v4 = vpop.eup %1396 }
 0x9cf   : > { %v760_v5 = vadd.f32 1.0, %v1397_v4 }
 0x9d1   : > { %1398 = vrcp.f32 %v760_v5  ;;  %v772_v13 = vand.u32 2147483648, %v760_v5  ;;  %vm766_vm14 = vweird.f32 %v760_v5  ;;  %v770_v15 = vand.u32 2147483647, %v760_v5 }
 0x9d3   : > { %v773_v17 = vor.u32 1.1754944e-38, %v772_v13  ;;  %vm771_vm0 = vcmp.eq.f32.partialorder %v770_v15, 8.507059e+37 }
 0x9d7   : > { %v1399_v6 = vpop.eup %1398 }
 0x9d8   : > { %v762_v7 = vmul.f32 %v1399_v6, %v760_v5  ;;  %vm767_vm13 = vweird.f32 %v1399_v6 }
 0x9d9   : > { %vm768_vm15 = vmor %vm766_vm14, %vm767_vm13  ;;  %vm525_vm13 = vcmask 257024  }
 0x9da   : > { %v763_v8 = vsub.f32 1.0, %v762_v7 }
 0x9dc   : > { %v764_v10 = vmul.f32 %v1399_v6, %v763_v8 }
 0x9de   : > { %v765_v11 = vadd.f32 %v1399_v6, %v764_v10 }
 0x9e0   : > { %v769_v16 = vsel %vm768_vm15, %v1399_v6, %v765_v11 }
 0x9e1   : > { %v774_v20 = vsel %vm771_vm0, %v773_v17, %v769_v16 }
 0x9e2   : > { %v788_v26 = vsub.f32 1.0, %v774_v20  ;;  %v794_v28 = vmul.f32 %v774_v20, %v726_v48 }
 0xa38   : > { %v779_v19 = vpop.permute.xlu0 %778 }
 0xa39   : > { %v781_v21 = vmul.f32 %v779_v19, %v774_v20 }
 0xa3b   : > { %783 = vrot.lane.b32.xlu1 %v781_v21, %s1461_s23 }
 0xaad   : > { %v784_v23 = vpop.permute.xlu1 %783 }
 0xaae   : > { %v786_v24 = vadd.f32 %v784_v23, %v755_v1 }
 0xab0   : > { %1400 = vtanh.f32 %v786_v24 }
 0xab6   : > { %v1401_v25 = vpop.eup %1400 }
 0xab7   : > { %790 = vrot.lane.b32.xlu2 %v1401_v25, %s1464_s30 }
 0xb11   : > { %v791_v27 = vpop.permute.xlu2 %790 }
 0xb12   : > { %v793_v29 = vmul.f32 %v791_v27, %v788_v26 }
 0xb14   : > { %v795_v30 = vadd.f32 %v794_v28, %v793_v29 }
 0xb16   : > { %v1647_v31 = vpack.c.bf16 %v795_v30, %v795_v30 }
 0xb18   : > { %v803_v32 = vunpack.c.l.b16 %v1647_v31 }
 0xb1a   : > { %v804_v33 = vpack.c.b16 %v803_v32, %v803_v32 }
 0xb1c   : > { %805 = vrot.lane.b32.xlu0 %v804_v33, %s1464_s30 }
 0xb8e   : > { %v806_v35 = vpop.permute.xlu0 %805 }
 0xb8f   : > { %1308 = vmatmul.msk.bf16.vlgmr.msra.gmra.mxu2 %vm453_vm1, %v806_v35 }
 0xc12   : > { %v819_v36 = vpop.f32.mrf.mxu2 }
 0xc13   : > { %v845_v37 = vadd.f32 %v819_v36, %v1568_v18  ;;  %v825_v41 = vadd.f32 %v824_v40, %v819_v36 }
 0xc15   : > { %847 = vrot.lane.b32.xlu1 %v845_v37, %s1461_s23  ;;  %v1309_v42 = vmul.f32 -1.442695, %v825_v41 }
 0xc17   : > { %1402 = vpow2.f32 %v1309_v42 }
 0xc1a   : > { %v821_v38 = vpop.f32.mrf.mxu2 }
 0xc1d   : > { %346 = vperm.xlu1 %1368, %v323_v39   ;;  %v1403_v43 = vpop.eup %1402 }
 0xc1e   : > { %v829_v44 = vadd.f32 1.0, %v1403_v43 }
 0xc20   : > { %1404 = vrcp.f32 %v829_v44  ;;  %v841_v51 = vand.u32 2147483648, %v829_v44  ;;  %vm835_vm3 = vweird.f32 %v829_v44  ;;  %v839_v52 = vand.u32 2147483647, %v829_v44 }
 0xc22   : > { %v842_v55 = vor.u32 1.1754944e-38, %v841_v51  ;;  %vm840_vm7 = vcmp.eq.f32.partialorder %v839_v52, 8.507059e+37 }
 0xc26   : > { %v1405_v45 = vpop.eup %1404 }
 0xc27   : > { %v831_v46 = vmul.f32 %v1405_v45, %v829_v44  ;;  %vm836_vm2 = vweird.f32 %v1405_v45 }
 0xc28   : > { %vm837_vm6 = vmor %vm835_vm3, %vm836_vm2 }
 0xc29   : > { %v832_v47 = vsub.f32 1.0, %v831_v46 }
 0xc2b   : > { %v833_v48 = vmul.f32 %v1405_v45, %v832_v47 }
 0xc2d   : > { %v834_v50 = vadd.f32 %v1405_v45, %v833_v48 }
 0xc2f   : > { %v838_v54 = vsel %vm837_vm6, %v1405_v45, %v834_v50 }
 0xc30   : > { %v843_v57 = vsel %vm840_vm7, %v842_v55, %v838_v54 }
 0xc31   : > { %v857_v4 = vsub.f32 1.0, %v843_v57  ;;  %v863_v6 = vmul.f32 %v843_v57, %v795_v30 }
 0xc87   : > { %v848_v56 = vpop.permute.xlu1 %847 }
 0xc88   : > { %v850_v58 = vmul.f32 %v848_v56, %v843_v57 }
 0xc8a   : > { %852 = vrot.lane.b32.xlu2 %v850_v58, %s1461_s23 }
 0xc8f   : > { %v347_v62 = vpop.permute.xlu1 %346 }
 0xc90   : > { %vm357_vm8 = vcmp.eq.s32.totalorder %v347_v62, %v1561_v12 }
 0xc91   : > { %v365_v1 = vsel %vm357_vm8, 1.0, %v1463_v14 }
 0xc92   : > { %349 = vperm.xlu2 %1367, %v324_v59  }
 0xce4   : > { %v853_v60 = vpop.permute.xlu2 %852 }
 0xce5   : > { %v855_v61 = vadd.f32 %v853_v60, %v824_v40 }
 0xce7   : > { %1406 = vtanh.f32 %v855_v61 }
 0xcec   : > { %v350_v63 = vpop.permute.xlu2 %349 }
 0xced   : > { %v1407_v0 = vpop.eup %1406  ;;  %vm358_vm9 = vcmp.eq.s32.totalorder %v350_v63, %v1561_v12 }
 0xcee   : > { %v366_v2 = vsel %vm358_vm9, 1.0, %v1463_v14  ;;  %859 = vrot.lane.b32.xlu0 %v1407_v0, %s1464_s30 }
 0xcef   : > { %v370_v3 = vpack.c.bf16 %v366_v2, %v365_v1 }
 0xcf1   : > { %1289 = vmatmul.msk.bf16.gmra.mxu0 %vm383_vm4, %v370_v3 }
 0xd60   : > { %v860_v5 = vpop.permute.xlu0 %859 }
 0xd61   : > { %v862_v7 = vmul.f32 %v860_v5, %v857_v4 }
 0xd63   : > { %v864_v8 = vadd.f32 %v863_v6, %v862_v7 }
 0xd65   : > { %v865_v10 = vpack.c.bf16 %v864_v8, %v864_v8 }
 0xd67   : > { %v872_v11 = vunpack.c.l.b16 %v865_v10 }
 0xd69   : > { %v873_v13 = vpack.c.b16 %v872_v11, %v872_v11 }
 0xd6b   : > { %874 = vrot.lane.b32.xlu0 %v873_v13, %s1464_s30 }
 0xd6e   : > { %v420_v12 = vpop.f32.mrf.mxu0 }
 0xd6f   : > { %v421_v15 = vadd.f32 %v1575_v22, %v420_v12 }
 0xd71   : > { %432 = vst.msk [vmem:[#allocation3 + $0x30] sm:$0xff] %vm425_vm5, %v421_v15 }
 0xd76   : > { %v422_v14 = vpop.f32.mrf.mxu0 }
 0xd77   : > { %v423_v16 = vadd.f32 %v1575_v22, %v422_v14 }
 0xd78   : > { %v893_v23 = vld [vmem:[#allocation3 + $0x30] sm:$0xff] }
 0xd79   : > { %433 = vst.msk [vmem:[#allocation3 + $0x38] sm:$0xff] %vm425_vm5, %v423_v16 }
 0xd80   : > { %v962_v59 = vld [vmem:[#allocation3 + $0x38] sm:$0xff] }
 0xddd   : > { %v875_v17 = vpop.permute.xlu0 %874 }
 0xdde   : > { %1310 = vmatmul.msk.bf16.vlgmr.msrb.gmra.mxu1 %vm453_vm1, %v875_v17 }
 0xe5b   : > { %v888_v19 = vpop.f32.mrf.mxu1 }
 0xe5c   : > { %v914_v20 = vadd.f32 %v888_v19, %v1568_v18  ;;  %v894_v24 = vadd.f32 %v893_v23, %v888_v19 }
 0xe5e   : > { %916 = vrot.lane.b32.xlu1 %v914_v20, %s1461_s23  ;;  %v1311_v25 = vmul.f32 -1.442695, %v894_v24 }
 0xe60   : > { %1408 = vpow2.f32 %v1311_v25 }
 0xe63   : > { %v890_v21 = vpop.f32.mrf.mxu1 }
 0xe64   : > { %v1712_v21 = vld [vmem:[%s1837_s7] ss:$0 sm:$0xff] }
 0xe66   : > { %v1409_v26 = vpop.eup %1408 }
 0xe67   : > { %v898_v27 = vadd.f32 1.0, %v1409_v26 }
 0xe69   : > { %1410 = vrcp.f32 %v898_v27  ;;  %v910_v33 = vand.u32 2147483648, %v898_v27  ;;  %vm904_vm10 = vweird.f32 %v898_v27  ;;  %v908_v35 = vand.u32 2147483647, %v898_v27 }
 0xe6b   : > { %v911_v37 = vor.u32 1.1754944e-38, %v910_v33  ;;  %vm909_vm12 = vcmp.eq.f32.partialorder %v908_v35, 8.507059e+37 }
 0xe6f   : > { %v1411_v28 = vpop.eup %1410 }
 0xe70   : > { %v900_v22 = vmul.f32 %v1411_v28, %v898_v27  ;;  %vm905_vm5 = vweird.f32 %v1411_v28 }
 0xe71   : > { %vm906_vm11 = vmor %vm904_vm10, %vm905_vm5 }
 0xe72   : > { %v901_v29 = vsub.f32 1.0, %v900_v22 }
 0xe74   : > { %v902_v30 = vmul.f32 %v1411_v28, %v901_v29 }
 0xe76   : > { %v903_v32 = vadd.f32 %v1411_v28, %v902_v30 }
 0xe78   : > { %v907_v36 = vsel %vm906_vm11, %v1411_v28, %v903_v32 }
 0xe79   : > { %v912_v39 = vsel %vm909_vm12, %v911_v37, %v907_v36 }
 0xe7a   : > { %v926_v44 = vsub.f32 1.0, %v912_v39  ;;  %v932_v46 = vmul.f32 %v912_v39, %v864_v8 }
 0xed0   : > { %v917_v38 = vpop.permute.xlu1 %916 }
 0xed1   : > { %v919_v40 = vmul.f32 %v917_v38, %v912_v39 }
 0xed3   : > { %921 = vrot.lane.b32.xlu2 %v919_v40, %s1461_s23 }
 0xf2d   : > { %v922_v41 = vpop.permute.xlu2 %921 }
 0xf2e   : > { %v924_v42 = vadd.f32 %v922_v41, %v893_v23 }
 0xf30   : > { %1412 = vtanh.f32 %v924_v42 }
 0xf36   : > { %v1413_v43 = vpop.eup %1412 }
 0xf37   : > { %928 = vrot.lane.b32.xlu0 %v1413_v43, %s1464_s30 }
 0xfa9   : > { %v929_v45 = vpop.permute.xlu0 %928 }
 0xfaa   : > { %v931_v47 = vmul.f32 %v929_v45, %v926_v44 }
 0xfac   : > { %v1673_v48 = vadd.f32 %v932_v46, %v931_v47 }
 0xfae   : > { %v934_v50 = vpack.c.bf16 %v1673_v48, %v1673_v48 }
 0xfb0   : > { %v941_v51 = vunpack.c.l.b16 %v934_v50 }
 0xfb2   : > { %v942_v52 = vpack.c.b16 %v941_v51, %v941_v51 }
 0xfb4   : > { %943 = vrot.lane.b32.xlu1 %v942_v52, %s1464_s30 }
 0xfbc   : > { %522 = vrot.lane.b32.xlu1 %v1583_v53, %s1464_s30 }
 0xfc4   : > { %660 = vrot.lane.b32.xlu1 %v1616_v9, %s1464_s30 }
 0xfcc   : > { %867 = vrot.lane.b32.xlu1 %v865_v10, %s1464_s30 }
0x1026   : > { %v944_v54 = vpop.permute.xlu1 %943 }
0x1027   : > { %1312 = vmatmul.msk.bf16.vlgmr.msrb.gmra.mxu2 %vm453_vm1, %v944_v54 }
0x102e   : > { %v523_v55 = vpop.permute.xlu1 %522 }
0x102f   : > { %526 = vst.msk [vmem:[#allocation4] sm:$0xf] %vm525_vm13, %v523_v55 }
0x1036   : > { %v661_v56 = vpop.permute.xlu1 %660 }
0x1037   : > { %664 = vst.msk [vmem:[#allocation4 + $0x8] sm:$0xf] %vm525_vm13, %v661_v56 }
0x103e   : > { %v868_v57 = vpop.permute.xlu1 %867 }
0x103f   : > { %871 = vst.msk [vmem:[#allocation4 + $0x14] sm:$0xf] %vm525_vm13, %v868_v57 }
0x10aa   : > { %v957_v58 = vpop.f32.mrf.mxu2 }
0x10ab   : > { %v983_v53 = vadd.f32 %v957_v58, %v1568_v18  ;;  %v963_v60 = vadd.f32 %v962_v59, %v957_v58  ;;  %v1352_v18 = vld [vmem:[%s1836_s6 + $0x8] sm:$0xff] }
0x10ac   : > { %1081 = vmatpush.bf16.msra.mxu3 %v1352_v18 }
0x10ad   : > { %985 = vrot.lane.b32.xlu2 %v983_v53, %s1461_s23  ;;  %v1313_v61 = vmul.f32 -1.442695, %v963_v60 }
0x10af   : > { %1414 = vpow2.f32 %v1313_v61 }
0x10b2   : > { %v959_v9 = vpop.f32.mrf.mxu2 }
0x10b5   : > { %591 = vrot.lane.b32.xlu2 %v1601_v34, %s1464_s30  ;;  %v1415_v62 = vpop.eup %1414  ;;  %v1351_v34 = vld [vmem:[%s1836_s6] sm:$0xff] }
0x10b6   : > { %v967_v63 = vadd.f32 1.0, %v1415_v62  ;;  %1082 = vmatpush.bf16.msra.mxu3 %v1351_v34 }
0x10b8   : > { %1416 = vrcp.f32 %v967_v63  ;;  %v979_v4 = vand.u32 2147483648, %v967_v63  ;;  %vm973_vm15 = vweird.f32 %v967_v63  ;;  %v977_v5 = vand.u32 2147483647, %v967_v63 }
0x10ba   : > { %v980_v7 = vor.u32 1.1754944e-38, %v979_v4  ;;  %vm978_vm2 = vcmp.eq.f32.partialorder %v977_v5, 8.507059e+37 }
0x10bd   : > { %729 = vrot.lane.b32.xlu2 %v1627_v49, %s1464_s30 }
0x10be   : > { %v1417_v0 = vpop.eup %1416 }
0x10bf   : > { %v969_v49 = vmul.f32 %v1417_v0, %v967_v63  ;;  %vm974_vm14 = vweird.f32 %v1417_v0 }
0x10c0   : > { %vm975_vm0 = vmor %vm973_vm15, %vm974_vm14 }
0x10c1   : > { %v970_v1 = vsub.f32 1.0, %v969_v49 }
0x10c3   : > { %v971_v2 = vmul.f32 %v1417_v0, %v970_v1 }
0x10c5   : > { %936 = vrot.lane.b32.xlu2 %v934_v50, %s1464_s30  ;;  %v972_v3 = vadd.f32 %v1417_v0, %v971_v2 }
0x10c7   : > { %v976_v6 = vsel %vm975_vm0, %v1417_v0, %v972_v3 }
0x10c8   : > { %v981_v10 = vsel %vm978_vm2, %v980_v7, %v976_v6 }
0x10c9   : > { %v995_v32 = vsub.f32 1.0, %v981_v10  ;;  %v1001_v35 = vmul.f32 %v981_v10, %v1673_v48 }
0x1107   : > { %v986_v8 = vpop.permute.xlu2 %985 }
0x1108   : > { %v988_v11 = vmul.f32 %v986_v8, %v981_v10 }
0x110a   : > { %990 = vrot.lane.b32.xlu0 %v988_v11, %s1461_s23 }
0x110f   : > { %v592_v13 = vpop.permute.xlu2 %591 }
0x1110   : > { %595 = vst.msk [vmem:[#allocation4 + $0x4] sm:$0xf] %vm525_vm13, %v592_v13 }
0x1117   : > { %v730_v12 = vpop.permute.xlu2 %729  ;;  %v1347_v15 = vld [vmem:[#allocation4] sm:$0xff] }
0x1118   : > { %733 = vst.msk [vmem:[#allocation4 + $0xc] sm:$0xf] %vm525_vm13, %v730_v12  ;;  %1338 = vmatmul.msk.bf16.vlgmr.msra.gmra.mxu3 %vm453_vm1, %v1347_v15 }
0x111f   : > { %v937_v14 = vpop.permute.xlu2 %936  ;;  %v1348_v16 = vld [vmem:[#allocation4 + $0x8] sm:$0xff] }
0x1120   : > { %940 = vst.msk [vmem:[#allocation4 + $0x18] sm:$0xf] %vm525_vm13, %v937_v14 }
0x1128   : > { %1339 = vmatmul.msk.bf16.gmra.mxu3 %vm453_vm1, %v1348_v16 }
0x117c   : > { %v991_v17 = vpop.permute.xlu0 %990 }
0x117d   : > { %v993_v19 = vadd.f32 %v991_v17, %v962_v59 }
0x117f   : > { %1418 = vtanh.f32 %v993_v19 }
0x1185   : > { %v1419_v20 = vpop.eup %1418 }
0x1186   : > { %997 = vrot.lane.b32.xlu0 %v1419_v20, %s1464_s30 }
0x118e   : > { %798 = vrot.lane.b32.xlu0 %v1647_v31, %s1464_s30 }
0x119b   : > { %v1084_v23 = vpop.f32.mrf.mxu3 }
0x119c   : > { %v1715_v24 = vadd.f32 %v1712_v21, %v1084_v23 }
0x119e   : > { %v1104_v25 = vsel %vm383_vm4, %v1715_v24, -inf }
0x119f   : > { %1105 = vmax.xlane.f32.xlu1 %v1104_v25 }
0x11a3   : > { %v1086_v26 = vpop.f32.mrf.mxu3 }
0x11a4   : > { %v1720_v27 = vadd.f32 %v1712_v21, %v1086_v26 }
0x11a6   : > { %v1107_v31 = vsel %vm383_vm4, %v1720_v27, -inf }
0x11a7   : > { %1108 = vmax.xlane.f32.xlu2 %v1107_v31 }
0x11ab   : > { %v1089_v28 = vpop.f32.mrf.mxu3 }
0x11ac   : > { %v1738_v41 = vadd.f32 %v1712_v21, %v1089_v28 }
0x11ae   : > { %v1110_v42 = vsel %vm383_vm4, %v1738_v41, -inf }
0x11b3   : > { %v1091_v22 = vpop.f32.mrf.mxu3 }
0x11b4   : > { %v1725_v29 = vadd.f32 %v1712_v21, %v1091_v22 }
0x11b6   : > { %v1113_v30 = vsel %vm383_vm4, %v1725_v29, -inf }
0x11b7   : > { %1114 = vmax.xlane.f32.xlu2 %v1113_v30 }
0x11f8   : > { %v998_v33 = vpop.permute.xlu0 %997 }
0x11f9   : > { %v1000_v36 = vmul.f32 %v998_v33, %v995_v32 }
0x11fb   : > { %v1730_v37 = vadd.f32 %v1001_v35, %v1000_v36 }
0x11fd   : > { %v1003_v38 = vpack.c.bf16 %v1730_v37, %v1730_v37 }
0x11ff   : > { %1005 = vrot.lane.b32.xlu0 %v1003_v38, %s1464_s30 }
0x1200   : > { %v799_v39 = vpop.permute.xlu0 %798 }
0x1201   : > { %802 = vst.msk [vmem:[#allocation4 + $0x10] sm:$0xf] %vm525_vm13, %v799_v39 }
0x1208   : > { %v1349_v40 = vld [vmem:[#allocation4 + $0x10] sm:$0xff] }
0x1209   : > { %1340 = vmatmul.msk.bf16.gmra.mxu3 %vm453_vm1, %v1349_v40 }
0x1212   : > { %v1744_v45 = vpop.xlane.xlu1 %1105 }
0x1213   : > { %v1128_v50 = vsub.f32 %v1715_v24, %v1744_v45 }
0x1215   : > { %v1136_v52 = vmul.f32 1.442695, %v1128_v50 }
0x1217   : > { %1420 = vpow2.f32 %v1136_v52 }
0x121a   : > { %v1746_v46 = vpop.xlane.xlu2 %1108 }
0x121b   : > { %v1129_v62 = vsub.f32 %v1720_v27, %v1746_v46 }
0x121d   : > { %v1421_v9 = vpop.eup %1420  ;;  %v1138_v63 = vmul.f32 1.442695, %v1129_v62 }
0x121e   : > { %v1152_v59 = vsel %vm383_vm4, %v1421_v9, 0.0 }
0x1229   : > { %1111 = vmax.xlane.f32.xlu0 %v1110_v42 }
0x122a   : > { %v1115_v54 = vpop.xlane.xlu2 %1114 }
0x122b   : > { %v1131_v57 = vsub.f32 %v1725_v29, %v1115_v54 }
0x122d   : > { %v1142_v53 = vmul.f32 1.442695, %v1131_v57 }
0x122f   : > { %1422 = vpow2.f32 %v1142_v53 }
0x1230   : > { %1424 = vpow2.f32 %v1138_v63 }
0x1235   : > { %v1423_v60 = vpop.eup %1422 }
0x1236   : > { %v1161_v61 = vsel %vm383_vm4, %v1423_v60, 0.0  ;;  %v1425_v5 = vpop.eup %1424 }
0x1237   : > { %v1155_v11 = vsel %vm383_vm4, %v1425_v5, 0.0 }
0x1271   : > { %v1006_v43 = vpop.permute.xlu0 %1005 }
0x1272   : > { %1009 = vst.msk [vmem:[#allocation4 + $0x1c] sm:$0xf] %vm525_vm13, %v1006_v43 }
0x1279   : > { %v1350_v44 = vld [vmem:[#allocation4 + $0x18] sm:$0xff] }
0x127a   : > { %1341 = vmatmul.msk.bf16.gmra.mxu3 %vm453_vm1, %v1350_v44 }
0x128c   : > { %v1094_v47 = vpop.f32.mrf.mxu3 }
0x128d   : > { %v1749_v48 = vadd.f32 %v1712_v21, %v1094_v47 }
0x128f   : > { %v1116_v51 = vsel %vm383_vm4, %v1749_v48, -inf }
0x1290   : > { %1117 = vmax.xlane.f32.xlu1 %v1116_v51 }
0x1294   : > { %v1096_v55 = vpop.f32.mrf.mxu3 }
0x1295   : > { %v1756_v56 = vadd.f32 %v1712_v21, %v1096_v55 }
0x1297   : > { %v1119_v58 = vsel %vm383_vm4, %v1756_v56, -inf }
0x1298   : > { %1120 = vmax.xlane.f32.xlu2 %v1119_v58 }
0x129c   : > { %v1765_v18 = vpop.xlane.xlu0 %1111 }
0x129d   : > { %v1130_v49 = vsub.f32 %v1738_v41, %v1765_v18 }
0x129f   : > { %v1140_v2 = vmul.f32 1.442695, %v1130_v49 }
0x12a0   : > { %1153 = vadd.xlane.f32.xlu2 %v1152_v59 }
0x12a1   : > { %1426 = vpow2.f32 %v1140_v2 }
0x12a7   : > { %v1427_v15 = vpop.eup %1426 }
0x12a8   : > { %1162 = vadd.xlane.f32.xlu2 %v1161_v61  ;;  %v1158_v19 = vsel %vm383_vm4, %v1427_v15, 0.0 }
0x12fd   : > { %v1099_v0 = vpop.f32.mrf.mxu3 }
0x12fe   : > { %v1768_v34 = vadd.f32 %v1712_v21, %v1099_v0 }
0x1300   : > { %v1122_v1 = vsel %vm383_vm4, %v1768_v34, -inf }
0x1301   : > { %1123 = vmax.xlane.f32.xlu0 %v1122_v1 }
0x1303   : > { %v1774_v3 = vpop.xlane.xlu1 %1117 }
0x1304   : > { %v1132_v4 = vsub.f32 %v1749_v48, %v1774_v3 }
0x1305   : > { %v1101_v6 = vpop.f32.mrf.mxu3 }
0x1306   : > { %v1144_v7 = vmul.f32 1.442695, %v1132_v4  ;;  %v1779_v8 = vadd.f32 %v1712_v21, %v1101_v6 }
0x1308   : > { %1428 = vpow2.f32 %v1144_v7  ;;  %v1125_v10 = vsel %vm383_vm4, %v1779_v8, -inf }
0x1309   : > { %1126 = vmax.xlane.f32.xlu1 %v1125_v10  ;;  %1156 = vadd.xlane.f32.xlu0 %v1155_v11 }
0x130b   : > { %v1784_v13 = vpop.xlane.xlu2 %1120 }
0x130c   : > { %v1133_v12 = vsub.f32 %v1756_v56, %v1784_v13 }
0x130e   : > { %v1429_v14 = vpop.eup %1428  ;;  %v1146_v16 = vmul.f32 1.442695, %v1133_v12 }
0x130f   : > { %v1164_v17 = vsel %vm383_vm4, %v1429_v14, 0.0 }
0x1310   : > { %1430 = vpow2.f32 %v1146_v16 }
0x1311   : > { %1165 = vadd.xlane.f32.xlu0 %v1164_v17  ;;  %1159 = vadd.xlane.f32.xlu1 %v1158_v19 }
0x1313   : > { %v1154_v20 = vpop.xlane.xlu2 %1153 }
0x1314   : > { %1432 = vlog2.f32 %v1154_v20 }
0x1316   : > { %v1431_v21 = vpop.eup %1430 }
0x1317   : > { %v1167_v23 = vsel %vm383_vm4, %v1431_v21, 0.0 }
0x1319   : > { %1168 = vadd.xlane.f32.xlu1 %v1167_v23 }
0x131a   : > { %v1433_v25 = vpop.eup %1432 }
0x131b   : > { %v1177_v26 = vmul.f32 0.6931472, %v1433_v25  ;;  %v1163_v31 = vpop.xlane.xlu2 %1162 }
0x131c   : > { %1434 = vlog2.f32 %v1163_v31 }
0x131d   : > { %v1192_v28 = vadd.f32 %v1177_v26, %v1744_v45 }
0x131f   : > { %v1200_v22 = vsub.f32 %v1715_v24, %v1192_v28 }
0x1321   : > { %1208 = vst.msk [vmem:[%s1526_s14] sm:$0xff] %vm383_vm4, %v1200_v22 }
0x1322   : > { %v1435_v30 = vpop.eup %1434 }
0x1323   : > { %v1183_v32 = vmul.f32 0.6931472, %v1435_v30 }
0x1325   : > { %v1195_v33 = vadd.f32 %v1183_v32, %v1115_v54 }
0x1327   : > { %v1203_v35 = vsub.f32 %v1725_v29, %v1195_v33 }
0x1329   : > { %1211 = vst.msk [vmem:[%s1526_s14 + $0x18] sm:$0xff] %vm383_vm4, %v1203_v35 }
0x1332   : > { %1011 = vrot.lane.b32.xlu1 %v1730_v37, %s1464_s30 }
0x1374   : > { %v1124_v36 = vpop.xlane.xlu0 %1123 }
0x1375   : > { %v1134_v38 = vsub.f32 %v1768_v34, %v1124_v36 }
0x1377   : > { %v1148_v39 = vmul.f32 1.442695, %v1134_v38 }
0x1379   : > { %1436 = vpow2.f32 %v1148_v39 }
0x137c   : > { %v1127_v40 = vpop.xlane.xlu1 %1126  ;;  %v1157_v42 = vpop.xlane.xlu0 %1156 }
0x137d   : > { %v1135_v24 = vsub.f32 %v1779_v8, %v1127_v40  ;;  %1438 = vlog2.f32 %v1157_v42 }
0x137f   : > { %v1437_v43 = vpop.eup %1436  ;;  %v1150_v44 = vmul.f32 1.442695, %v1135_v24 }
0x1380   : > { %v1170_v29 = vsel %vm383_vm4, %v1437_v43, 0.0 }
0x1381   : > { %1440 = vpow2.f32 %v1150_v44  ;;  %1171 = vadd.xlane.f32.xlu2 %v1170_v29 }
0x1383   : > { %v1439_v45 = vpop.eup %1438 }
0x1384   : > { %v1179_v47 = vmul.f32 0.6931472, %v1439_v45  ;;  %v1160_v37 = vpop.xlane.xlu1 %1159  ;;  %v1166_v50 = vpop.xlane.xlu0 %1165 }
0x1385   : > { %1442 = vlog2.f32 %v1160_v37 }
0x1386   : > { %v1193_v51 = vadd.f32 %v1179_v47, %v1746_v46  ;;  %1444 = vlog2.f32 %v1166_v50 }
0x1387   : > { %v1441_v52 = vpop.eup %1440 }
0x1388   : > { %v1201_v54 = vsub.f32 %v1720_v27, %v1193_v51  ;;  %v1173_v55 = vsel %vm383_vm4, %v1441_v52, 0.0 }
0x1389   : > { %1174 = vadd.xlane.f32.xlu0 %v1173_v55 }
0x138a   : > { %1209 = vst.msk [vmem:[%s1526_s14 + $0x8] sm:$0xff] %vm383_vm4, %v1201_v54 }
0x138b   : > { %v1443_v57 = vpop.eup %1442 }
0x138c   : > { %v1445_v58 = vpop.eup %1444  ;;  %v1181_v53 = vmul.f32 0.6931472, %v1443_v57  ;;  %v1169_v9 = vpop.xlane.xlu1 %1168 }
0x138d   : > { %v1185_v59 = vmul.f32 0.6931472, %v1445_v58  ;;  %1446 = vlog2.f32 %v1169_v9 }
0x138e   : > { %v1194_v46 = vadd.f32 %v1181_v53, %v1765_v18 }
0x138f   : > { %v1196_v60 = vadd.f32 %v1185_v59, %v1774_v3 }
0x1390   : > { %v1202_v61 = vsub.f32 %v1738_v41, %v1194_v46 }
0x1391   : > { %v1204_v27 = vsub.f32 %v1749_v48, %v1196_v60 }
0x1392   : > { %1210 = vst.msk [vmem:[%s1526_s14 + $0x10] sm:$0xff] %vm383_vm4, %v1202_v61 }
0x1393   : > { %v1447_v62 = vpop.eup %1446  ;;  %1212 = vst.msk [vmem:[%s1526_s14 + $0x20] sm:$0xff] %vm383_vm4, %v1204_v27 }
0x1394   : > { %v1187_v63 = vmul.f32 0.6931472, %v1447_v62 }
0x1396   : > { %v1197_v0 = vadd.f32 %v1187_v63, %v1784_v13 }
0x1398   : > { %v1205_v49 = vsub.f32 %v1756_v56, %v1197_v0 }
0x139a   : > { %1213 = vst.msk [vmem:[%s1526_s14 + $0x28] sm:$0xff] %vm383_vm4, %v1205_v49 }
0x13a4   : > { %v1012_v18 = vpop.permute.xlu1 %1011 }
0x13a5   : > { %1014 = vst.msk [vmem:[#allocation2] sm:$0xff] %vm453_vm1, %v1012_v18 }
0x13f4   : > { %v1172_v41 = vpop.xlane.xlu2 %1171 }
0x13f5   : > { %1448 = vlog2.f32 %v1172_v41 }
0x13fb   : > { %v1449_v48 = vpop.eup %1448 }
0x13fc   : > { %v1189_v1 = vmul.f32 0.6931472, %v1449_v48  ;;  %v1175_v2 = vpop.xlane.xlu0 %1174 }
0x13fd   : > { %1450 = vlog2.f32 %v1175_v2 }
0x13fe   : > { %v1198_v3 = vadd.f32 %v1189_v1, %v1124_v36 }
0x1400   : > { %v1206_v4 = vsub.f32 %v1768_v34, %v1198_v3 }
0x1402   : > { %1214 = vst.msk [vmem:[%s1526_s14 + $0x30] sm:$0xff] %vm383_vm4, %v1206_v4 }
0x1403   : > { %v1451_v5 = vpop.eup %1450 }
0x1404   : > { %v1191_v6 = vmul.f32 0.6931472, %v1451_v5 }
0x1406   : > { %v1199_v56 = vadd.f32 %v1191_v6, %v1127_v40 }
0x1408   : > { %v1207_v7 = vsub.f32 %v1779_v8, %v1199_v56 }
0x140a   : > { %1215 = vst.msk [vmem:[%s1526_s14 + $0x38] sm:$0xff] %vm383_vm4, %v1207_v7 }
0x140b PF: > { %s18_s27 = sadd.s32 1, %s1458_s27  }
0x140c   : > { %p15_p5 = scmp.ge.s32.totalorder %s18_s27, 4  }
0x140e   :  { %17 = sbr.rel (!%p15_p5) target bundleno = 1 (0x1), region = 100 }

</bundles_post_ra>
